<compile_context>
chip_gen: v5e
topology: v5e:2x2
jax: 0.10.0
libtpu: 0.0.40
codegen_flags: <defaults>
</compile_context>

<pallas_src>
import functools

import numpy as np
import jax
import jax.numpy as jnp
from jax.experimental import pallas as pl
from jax.experimental.pallas import tpu as pltpu


# ---------------------------------------------------------------------------
# earth position index (host-side, deterministic, pure numpy)
# ---------------------------------------------------------------------------
def get_earth_position_index_np(window_size):
    win_pl, win_lat, win_lon = window_size
    coords_zi = np.arange(win_pl)
    coords_zj = -np.arange(win_pl) * win_pl
    coords_hi = np.arange(win_lat)
    coords_hj = -np.arange(win_lat) * win_lat
    coords_w = np.arange(win_lon)

    coords_1 = np.stack(np.meshgrid(coords_zi, coords_hi, coords_w, indexing="ij"))
    coords_2 = np.stack(np.meshgrid(coords_zj, coords_hj, coords_w, indexing="ij"))
    coords_flatten_1 = coords_1.reshape(3, -1)
    coords_flatten_2 = coords_2.reshape(3, -1)
    coords = coords_flatten_1[:, :, None] - coords_flatten_2[:, None, :]
    coords = np.transpose(coords, (1, 2, 0)).copy()
    coords[:, :, 2] += win_lon - 1
    coords[:, :, 1] *= 2 * win_lon - 1
    coords[:, :, 0] *= (2 * win_lon - 1) * win_lat * win_lat
    return coords.sum(-1)  # (N, N) int


# ---------------------------------------------------------------------------
# earth position bias (hoisted out of the per-call path; constant per model)
# Stored bf16: it is the dominant HBM read of the attention kernel at real
# Pangu shapes (nW_*H*N*N); cast back to f32 inside the kernel before the add.
# ---------------------------------------------------------------------------
def build_earth_position_bias(params, *, window_size, input_resolution, num_heads,
                              dtype=jnp.bfloat16):
    N = window_size[0] * window_size[1] * window_size[2]
    type_of_windows = (input_resolution[0] // window_size[0]) * (
        input_resolution[1] // window_size[1]
    )
    epi = params["earth_position_index"].reshape(-1)
    bias = params["earth_position_bias_table"][epi]                 # (N*N, nW_, H)
    bias = bias.reshape(N, N, type_of_windows, num_heads)
    return bias.transpose(2, 3, 0, 1).astype(dtype)                 # (nW_, H, N, N)


# ---------------------------------------------------------------------------
# VMEM budgeting (generation-aware; includes in-kernel f32 temporaries)
# ---------------------------------------------------------------------------
def _vmem_budget_bytes():
    """(tile budget, vmem_limit_bytes) derived from per-core VMEM capacity."""
    try:
        cap = int(pltpu.get_tpu_info().vmem_capacity_bytes)
    except Exception:                                    # fall back: v7x per-core
        cap = 64 * 1024 * 1024
    # ~40% of physical per-core VMEM for blocks + temporaries, capped at 24 MiB
    # so tiles fit comfortably on v5e/v6e (128 MiB) *and* v7x (64 MiB / core).
    budget = min((cap * 2) // 5, 24 * 1024 * 1024)
    limit = min(cap // 2, max(32 * 1024 * 1024, budget + 8 * 1024 * 1024))
    return budget, limit


def _pick_w_tile(nW_, N, C, num_heads, x_itemsize, bias_itemsize, budget_bytes):
    """Largest divisor of nW_ (capped at nW_//2 so the window-type grid axis
    keeps extent >= 2, letting a v7x Megacore split land on window-types rather
    than duplicating the bias stream across cores) such that the double-buffered
    blocks PLUS in-kernel f32 temporaries fit the budget."""
    hd = C // num_heads
    per_w = (
        2 * (2 * N * C * x_itemsize + num_heads * N * N * bias_itemsize)  # x/out/bias blocks (x2 buffers)
        + N * 3 * C * 4            # qkv (f32)
        + 2 * N * N * 4            # s and p (f32), per live head
        + N * N * 2                # bf16 copy of p feeding the P@V matmul
        + num_heads * N * hd * 2   # per-head bf16 outputs held before concat
        + 2 * N * C * 4            # concatenated head output + projected out (f32)
    )
    # resident (constant-index) weight blocks: bf16 weights, f32 biases, x2 buffers
    fixed = 2 * ((C * 3 * C + C * C) * 2 + (3 * C + C) * 4)
    max_wt = max(1, nW_ // 2)
    best = 1
    for wt in range(1, max_wt + 1):
        if nW_ % wt == 0 and fixed + wt * per_w <= budget_bytes:
            best = wt
    return best


# ---------------------------------------------------------------------------
# fused Pallas kernel: qkv proj -> per-head biased attention -> output proj
# ---------------------------------------------------------------------------
def _fused_attn_kernel(x_ref, bias_ref, wqkv_ref, bqkv_ref, wproj_ref, bproj_ref,
                       o_ref, *, num_heads, scale):
    # x_ref:     (1, WT, N, C)   activation tile (input dtype)
    # bias_ref:  (WT, H, N, N)   earth position bias (bf16)
    # wqkv_ref:  (C, 3C) bf16    bqkv_ref:  (1, 3C) f32
    # wproj_ref: (C, C)  bf16    bproj_ref: (1, C)  f32
    # o_ref:     (1, WT, N, C)
    _, WT, N, C = x_ref.shape
    H = num_heads
    hd = C // H

    # --- fused qkv projection: bf16 MXU feed, f32 accumulation -------------
    x2 = x_ref[0].reshape(WT * N, C).astype(jnp.bfloat16)
    qkv = jnp.dot(x2, wqkv_ref[...], preferred_element_type=jnp.float32)
    qkv = qkv + bqkv_ref[...].astype(jnp.float32)
    qkv = qkv.reshape(WT, N, 3 * C)                                  # f32

    # --- per-head attention with earth position bias -----------------------
    outs = []
    for h in range(H):
        # lane slices of the lane-dense f32 qkv tile; q pre-scaled (N*hd mults)
        qh = (qkv[:, :, h * hd:(h + 1) * hd] * scale).astype(jnp.bfloat16)
        kh = qkv[:, :, C + h * hd:C + (h + 1) * hd].astype(jnp.bfloat16)
        vh = qkv[:, :, 2 * C + h * hd:2 * C + (h + 1) * hd].astype(jnp.bfloat16)

        s = jnp.einsum("wnd,wmd->wnm", qh, kh,
                       preferred_element_type=jnp.float32)           # (WT, N, N) f32
        s = s + bias_ref[:, h, :, :].astype(jnp.float32)

        m = jnp.max(s, axis=-1, keepdims=True)
        p = jnp.exp(s - m)                                           # unnormalized
        denom = jnp.sum(p, axis=-1, keepdims=True)                   # (WT, N, 1)

        oh = jnp.einsum("wnm,wmd->wnd", p.astype(jnp.bfloat16), vh,
                        preferred_element_type=jnp.float32)          # (WT, N, hd)
        # deferred softmax normalization: scale the (N, hd) output instead of
        # the (N, N) probabilities; divide runs on the EUP (separate slot).
        oh = oh * pl.reciprocal(denom, approx=True)
        outs.append(oh.astype(jnp.bfloat16))                         # small live set

    attn = jnp.concatenate(outs, axis=-1).reshape(WT * N, C)         # bf16 lane-dense

    # --- fused output projection + single lane-dense store -----------------
    out = jnp.dot(attn, wproj_ref[...], preferred_element_type=jnp.float32)
    out = out + bproj_ref[...].astype(jnp.float32)
    o_ref[0] = out.reshape(WT, N, C).astype(o_ref.dtype)


# ---------------------------------------------------------------------------
# EarthAttention3D forward (JAX glue + fused Pallas kernel)
# ---------------------------------------------------------------------------
def earth_attention_3d(x, params, *, window_size, input_resolution, num_heads,
                       bias=None, w_tile=None):
    B_, nW_, N, C = x.shape
    assert C % num_heads == 0
    hd = C // num_heads
    scale = hd ** (-0.5)
    type_of_windows = (input_resolution[0] // window_size[0]) * (
        input_resolution[1] // window_size[1]
    )
    assert nW_ == type_of_windows
    assert N == window_size[0] * window_size[1] * window_size[2]

    # earth position bias: (nW_, H, N, N), bf16 — precomputed at setup if given
    if bias is None:
        bias = build_earth_position_bias(
            params, window_size=window_size,
            input_resolution=input_resolution, num_heads=num_heads)
    bias = bias.astype(jnp.bfloat16)

    # bf16 MXU feeds for both projections (f32 accumulation inside the kernel);
    # the projection biases are added in f32.
    w_qkv = params["w_qkv"].astype(jnp.bfloat16)
    w_proj = params["w_proj"].astype(jnp.bfloat16)
    b_qkv = params["b_qkv"].reshape(1, 3 * C).astype(jnp.float32)
    b_proj = params["b_proj"].reshape(1, C).astype(jnp.float32)

    budget, vmem_limit = _vmem_budget_bytes()
    if w_tile is None:
        w_tile = _pick_w_tile(nW_, N, C, num_heads,
                              x.dtype.itemsize, bias.dtype.itemsize, budget)
    assert nW_ % w_tile == 0

    kernel = functools.partial(_fused_attn_kernel, num_heads=num_heads, scale=scale)
    out = pl.pallas_call(
        kernel,
        out_shape=jax.ShapeDtypeStruct((B_, nW_, N, C), x.dtype),
        grid_spec=pltpu.PrefetchScalarGridSpec(
            num_scalar_prefetch=0,
            # B_ innermost: the bias block index is constant across consecutive
            # steps so it stays resident in VMEM (no re-DMA per batch element).
            # B_ is "arbitrary" so a Megacore split lands on the window-type
            # axis (extent >= 2 via the w_tile cap) instead of duplicating the
            # bias stream across TensorCores.
            grid=(nW_ // w_tile, B_),
            in_specs=[
                pl.BlockSpec((1, w_tile, N, C), lambda wi, b: (b, wi, 0, 0)),
                pl.BlockSpec((w_tile, num_heads, N, N), lambda wi, b: (wi, 0, 0, 0)),
                pl.BlockSpec((C, 3 * C), lambda wi, b: (0, 0)),   # resident weights
                pl.BlockSpec((1, 3 * C), lambda wi, b: (0, 0)),
                pl.BlockSpec((C, C), lambda wi, b: (0, 0)),
                pl.BlockSpec((1, C), lambda wi, b: (0, 0)),
            ],
            out_specs=pl.BlockSpec((1, w_tile, N, C), lambda wi, b: (b, wi, 0, 0)),
        ),
        compiler_params=pltpu.CompilerParams(
            dimension_semantics=("parallel", "arbitrary"),
            vmem_limit_bytes=vmem_limit,
        ),
    )(x, bias, w_qkv, b_qkv, w_proj, b_proj)
    return out
    # TODO(synk): the shifted-window `mask is not None` branch and
    # attn_drop / proj_drop (identities at p=0.0) are not wired into the kernel;
    # only the non-shifted inference path is implemented.


# ---------------------------------------------------------------------------
# pure-JAX reference (mirrors the PyTorch SDPA path with mask=None, all f32)
# ---------------------------------------------------------------------------
def earth_attention_3d_ref(x, params, *, window_size, input_resolution, num_heads):
    B_, nW_, N, C = x.shape
    hd = C // num_heads
    scale = hd ** (-0.5)
    type_of_windows = (input_resolution[0] // window_size[0]) * (
        input_resolution[1] // window_size[1]
    )

    qkv = x @ params["w_qkv"] + params["b_qkv"]
    qkv = qkv.reshape(B_, nW_, N, 3, num_heads, hd).transpose(3, 0, 4, 1, 2, 5)
    q, k, v = qkv[0], qkv[1], qkv[2]

    epi = params["earth_position_index"].reshape(-1)
    bias = params["earth_position_bias_table"][epi]
    bias = bias.reshape(N, N, type_of_windows, num_heads).transpose(3, 2, 0, 1)

    attn = jnp.einsum("bhwnd,bhwmd->bhwnm", q, k) * scale + bias[None]
    attn = jax.nn.softmax(attn, axis=-1)
    out = jnp.einsum("bhwnm,bhwmd->bhwnd", attn, v)
    out = out.transpose(0, 2, 3, 1, 4).reshape(B_, nW_, N, C)
    out = out @ params["w_proj"] + params["b_proj"]
    return out


# ---------------------------------------------------------------------------
# main
# ---------------------------------------------------------------------------
if __name__ == "__main__":
    # small config consistent with the module's conventions
    dim = 32
    num_heads = 4
    window_size = (2, 2, 4)            # (win_pl, win_lat, win_lon)
    input_resolution = (4, 4, 8)       # (num_pl, num_lat, num_lon)
    num_lon = input_resolution[2] // window_size[2]            # 2
    type_of_windows = (input_resolution[0] // window_size[0]) * (
        input_resolution[1] // window_size[1]
    )                                                          # 4
    N = window_size[0] * window_size[1] * window_size[2]       # 16
    B = 2
    B_ = B * num_lon                                           # 4
    nW_ = type_of_windows                                      # 4
    table_rows = (
        window_size[0] ** 2 * window_size[1] ** 2 * (window_size[2] * 2 - 1)
    )                                                          # 112

    key = jax.random.PRNGKey(0)
    k1, k2, k3, k4, k5, k6 = jax.random.split(key, 6)

    params = {
        "w_qkv": jax.random.normal(k1, (dim, 3 * dim), jnp.float32) * 0.02,
        "b_qkv": jax.random.normal(k2, (3 * dim,), jnp.float32) * 0.02,
        "w_proj": jax.random.normal(k3, (dim, dim), jnp.float32) * 0.02,
        "b_proj": jax.random.normal(k4, (dim,), jnp.float32) * 0.02,
        "earth_position_bias_table": 0.02
        * jax.random.truncated_normal(
            k5, -2.0, 2.0, (table_rows, type_of_windows, num_heads), jnp.float32
        ),
        "earth_position_index": jnp.asarray(
            get_earth_position_index_np(window_size), dtype=jnp.int32
        ),
    }

    x = jax.random.normal(k6, (B_, nW_, N, dim), jnp.float32)

    # hoisted constant: build the (nW_, H, N, N) bf16 bias tensor once at setup
    bias = build_earth_position_bias(
        params, window_size=window_size,
        input_resolution=input_resolution, num_heads=num_heads)
    bias = jax.block_until_ready(bias)

    out = earth_attention_3d(
        x,
        params,
        window_size=window_size,
        input_resolution=input_resolution,
        num_heads=num_heads,
        bias=bias,
    )
    out = jax.block_until_ready(out)

    ref = earth_attention_3d_ref(
        x,
        params,
        window_size=window_size,
        input_resolution=input_resolution,
        num_heads=num_heads,
    )
    # tolerance accounts for bf16 MXU feeds (f32 accumulation), the bf16 bias
    # storage and the approximate EUP reciprocal in the deferred softmax scale
    np.testing.assert_allclose(np.asarray(out), np.asarray(ref), rtol=2e-3, atol=2e-3)

    print("KERNEL_OK")
</pallas_src>

<mosaic_0001>
module attributes {stable_mosaic.version = 11 : i64} {
  func.func @_fused_attn_kernel(%arg0: i32, %arg1: i32, %arg2: memref<1x2x16x32xf32, #tpu.memory_space<vmem>>, %arg3: memref<2x4x16x16xbf16, #tpu.memory_space<vmem>>, %arg4: memref<32x96xbf16, #tpu.memory_space<vmem>>, %arg5: memref<1x96xf32, #tpu.memory_space<vmem>>, %arg6: memref<32x32xbf16, #tpu.memory_space<vmem>>, %arg7: memref<1x32xf32, #tpu.memory_space<vmem>>, %arg8: memref<1x2x16x32xf32, #tpu.memory_space<vmem>>) attributes {dimension_semantics = [#tpu.dimension_semantics<parallel>, #tpu.dimension_semantics<arbitrary>], iteration_bounds = array<i64: 2, 4>, scalar_prefetch = 0 : i64, scratch_operands = 0 : i64, tpu.core_type = #tpu.core_type<tc>, window_params = [{transform_indices = @transform_0, window_bounds = array<i64: 1, 2, 16, 32>}, {transform_indices = @transform_1, window_bounds = array<i64: 2, 4, 16, 16>}, {pipeline_mode = #tpu.pipeline_mode<synchronous>, transform_indices = @transform_2, window_bounds = array<i64: 32, 96>}, {pipeline_mode = #tpu.pipeline_mode<synchronous>, transform_indices = @transform_3, window_bounds = array<i64: 1, 96>}, {pipeline_mode = #tpu.pipeline_mode<synchronous>, transform_indices = @transform_4, window_bounds = array<i64: 32, 32>}, {pipeline_mode = #tpu.pipeline_mode<synchronous>, transform_indices = @transform_5, window_bounds = array<i64: 1, 32>}, {transform_indices = @transform_6, window_bounds = array<i64: 1, 2, 16, 32>}]} {
    %c0 = arith.constant 0 : index
    %c0_0 = arith.constant 0 : index
    %c0_1 = arith.constant 0 : index
    %c0_2 = arith.constant 0 : index
    %0 = vector.load %arg2[%c0, %c0_0, %c0_1, %c0_2] : memref<1x2x16x32xf32, #tpu.memory_space<vmem>>, vector<1x2x16x32xf32>
    %1 = vector.shape_cast %0 : vector<1x2x16x32xf32> to vector<2x16x32xf32>
    %2 = vector.shape_cast %1 : vector<2x16x32xf32> to vector<32x32xf32>
    %3 = arith.truncf %2 : vector<32x32xf32> to vector<32x32xbf16>
    %c0_3 = arith.constant 0 : index
    %c0_4 = arith.constant 0 : index
    %4 = vector.load %arg4[%c0_3, %c0_4] : memref<32x96xbf16, #tpu.memory_space<vmem>>, vector<32x96xbf16>
    %cst = arith.constant dense<0.000000e+00> : vector<32x96xf32>
    %5 = tpu.matmul %3, %4, %cst {dimension_numbers = #tpu.dot_dimension_numbers<[1], [0], [0], [1], [0, 0, 1, 1], [], []>} : vector<32x32xbf16>, vector<32x96xbf16>, vector<32x96xf32> -> vector<32x96xf32>
    %c0_5 = arith.constant 0 : index
    %c0_6 = arith.constant 0 : index
    %6 = vector.load %arg5[%c0_5, %c0_6] : memref<1x96xf32, #tpu.memory_space<vmem>>, vector<1x96xf32>
    %7 = vector.broadcast %6 : vector<1x96xf32> to vector<32x96xf32>
    %8 = arith.addf %5, %7 : vector<32x96xf32>
    %9 = vector.shape_cast %8 : vector<32x96xf32> to vector<2x16x96xf32>
    %10 = vector.extract_strided_slice %9 {offsets = [0, 0, 0], sizes = [2, 16, 8], strides = [1, 1, 1]} : vector<2x16x96xf32> to vector<2x16x8xf32>
    %cst_7 = arith.constant 0.353553385 : f32
    %11 = vector.broadcast %cst_7 : f32 to vector<2x16x8xf32>
    %12 = arith.mulf %10, %11 : vector<2x16x8xf32>
    %13 = arith.truncf %12 : vector<2x16x8xf32> to vector<2x16x8xbf16>
    %14 = vector.extract_strided_slice %9 {offsets = [0, 0, 32], sizes = [2, 16, 8], strides = [1, 1, 1]} : vector<2x16x96xf32> to vector<2x16x8xf32>
    %15 = arith.truncf %14 : vector<2x16x8xf32> to vector<2x16x8xbf16>
    %16 = vector.extract_strided_slice %9 {offsets = [0, 0, 64], sizes = [2, 16, 8], strides = [1, 1, 1]} : vector<2x16x96xf32> to vector<2x16x8xf32>
    %17 = arith.truncf %16 : vector<2x16x8xf32> to vector<2x16x8xbf16>
    "tpu.trace_start"() <{level = 10 : i32, message = "wnd,wmd->wnm"}> : () -> ()
    %cst_8 = arith.constant dense<0.000000e+00> : vector<2x16x16xf32>
    %18 = tpu.matmul %13, %15, %cst_8 {dimension_numbers = #tpu.dot_dimension_numbers<[2], [2], [1], [1], [0, 0, 0, 1, 1, 1], [0], [0]>} : vector<2x16x8xbf16>, vector<2x16x8xbf16>, vector<2x16x16xf32> -> vector<2x16x16xf32>
    "tpu.trace_stop"() : () -> ()
    %c0_9 = arith.constant 0 : index
    %c0_10 = arith.constant 0 : index
    %c0_11 = arith.constant 0 : index
    %c0_12 = arith.constant 0 : index
    %19 = vector.load %arg3[%c0_9, %c0_10, %c0_11, %c0_12] : memref<2x4x16x16xbf16, #tpu.memory_space<vmem>>, vector<2x1x16x16xbf16>
    %20 = vector.shape_cast %19 : vector<2x1x16x16xbf16> to vector<2x16x16xbf16>
    %21 = arith.extf %20 : vector<2x16x16xbf16> to vector<2x16x16xf32>
    %22 = arith.addf %18, %21 : vector<2x16x16xf32>
    %cst_13 = arith.constant dense<0xFF800000> : vector<2x16xf32>
    %23 = vector.multi_reduction <maximumf>, %22, %cst_13 [2] : vector<2x16x16xf32> to vector<2x16xf32>
    %24 = vector.shape_cast %23 : vector<2x16xf32> to vector<2x16x1xf32>
    %25 = vector.broadcast %24 : vector<2x16x1xf32> to vector<2x16x16xf32>
    %26 = arith.subf %22, %25 : vector<2x16x16xf32>
    %27 = math.exp %26 : vector<2x16x16xf32>
    %cst_14 = arith.constant dense<0.000000e+00> : vector<2x16xf32>
    %28 = vector.multi_reduction <add>, %27, %cst_14 [2] : vector<2x16x16xf32> to vector<2x16xf32>
    %29 = vector.shape_cast %28 : vector<2x16xf32> to vector<2x16x1xf32>
    %30 = arith.truncf %27 : vector<2x16x16xf32> to vector<2x16x16xbf16>
    "tpu.trace_start"() <{level = 10 : i32, message = "wnm,wmd->wnd"}> : () -> ()
    %cst_15 = arith.constant dense<0.000000e+00> : vector<2x16x8xf32>
    %31 = tpu.matmul %30, %17, %cst_15 {dimension_numbers = #tpu.dot_dimension_numbers<[2], [1], [1], [2], [0, 0, 0, 1, 1, 2], [0], [0]>} : vector<2x16x16xbf16>, vector<2x16x8xbf16>, vector<2x16x8xf32> -> vector<2x16x8xf32>
    "tpu.trace_stop"() : () -> ()
    %32 = tpu.reciprocal %29 {approx = true} : vector<2x16x1xf32> -> vector<2x16x1xf32>
    %33 = vector.broadcast %32 : vector<2x16x1xf32> to vector<2x16x8xf32>
    %34 = arith.mulf %31, %33 : vector<2x16x8xf32>
    %35 = arith.truncf %34 : vector<2x16x8xf32> to vector<2x16x8xbf16>
    %36 = vector.extract_strided_slice %9 {offsets = [0, 0, 8], sizes = [2, 16, 8], strides = [1, 1, 1]} : vector<2x16x96xf32> to vector<2x16x8xf32>
    %cst_16 = arith.constant 0.353553385 : f32
    %37 = vector.broadcast %cst_16 : f32 to vector<2x16x8xf32>
    %38 = arith.mulf %36, %37 : vector<2x16x8xf32>
    %39 = arith.truncf %38 : vector<2x16x8xf32> to vector<2x16x8xbf16>
    %40 = vector.extract_strided_slice %9 {offsets = [0, 0, 40], sizes = [2, 16, 8], strides = [1, 1, 1]} : vector<2x16x96xf32> to vector<2x16x8xf32>
    %41 = arith.truncf %40 : vector<2x16x8xf32> to vector<2x16x8xbf16>
    %42 = vector.extract_strided_slice %9 {offsets = [0, 0, 72], sizes = [2, 16, 8], strides = [1, 1, 1]} : vector<2x16x96xf32> to vector<2x16x8xf32>
    %43 = arith.truncf %42 : vector<2x16x8xf32> to vector<2x16x8xbf16>
    "tpu.trace_start"() <{level = 10 : i32, message = "wnd,wmd->wnm"}> : () -> ()
    %cst_17 = arith.constant dense<0.000000e+00> : vector<2x16x16xf32>
    %44 = tpu.matmul %39, %41, %cst_17 {dimension_numbers = #tpu.dot_dimension_numbers<[2], [2], [1], [1], [0, 0, 0, 1, 1, 1], [0], [0]>} : vector<2x16x8xbf16>, vector<2x16x8xbf16>, vector<2x16x16xf32> -> vector<2x16x16xf32>
    "tpu.trace_stop"() : () -> ()
    %c0_18 = arith.constant 0 : index
    %c1 = arith.constant 1 : index
    %c0_19 = arith.constant 0 : index
    %c0_20 = arith.constant 0 : index
    %45 = vector.load %arg3[%c0_18, %c1, %c0_19, %c0_20] : memref<2x4x16x16xbf16, #tpu.memory_space<vmem>>, vector<2x1x16x16xbf16>
    %46 = vector.shape_cast %45 : vector<2x1x16x16xbf16> to vector<2x16x16xbf16>
    %47 = arith.extf %46 : vector<2x16x16xbf16> to vector<2x16x16xf32>
    %48 = arith.addf %44, %47 : vector<2x16x16xf32>
    %cst_21 = arith.constant dense<0xFF800000> : vector<2x16xf32>
    %49 = vector.multi_reduction <maximumf>, %48, %cst_21 [2] : vector<2x16x16xf32> to vector<2x16xf32>
    %50 = vector.shape_cast %49 : vector<2x16xf32> to vector<2x16x1xf32>
    %51 = vector.broadcast %50 : vector<2x16x1xf32> to vector<2x16x16xf32>
    %52 = arith.subf %48, %51 : vector<2x16x16xf32>
    %53 = math.exp %52 : vector<2x16x16xf32>
    %cst_22 = arith.constant dense<0.000000e+00> : vector<2x16xf32>
    %54 = vector.multi_reduction <add>, %53, %cst_22 [2] : vector<2x16x16xf32> to vector<2x16xf32>
    %55 = vector.shape_cast %54 : vector<2x16xf32> to vector<2x16x1xf32>
    %56 = arith.truncf %53 : vector<2x16x16xf32> to vector<2x16x16xbf16>
    "tpu.trace_start"() <{level = 10 : i32, message = "wnm,wmd->wnd"}> : () -> ()
    %cst_23 = arith.constant dense<0.000000e+00> : vector<2x16x8xf32>
    %57 = tpu.matmul %56, %43, %cst_23 {dimension_numbers = #tpu.dot_dimension_numbers<[2], [1], [1], [2], [0, 0, 0, 1, 1, 2], [0], [0]>} : vector<2x16x16xbf16>, vector<2x16x8xbf16>, vector<2x16x8xf32> -> vector<2x16x8xf32>
    "tpu.trace_stop"() : () -> ()
    %58 = tpu.reciprocal %55 {approx = true} : vector<2x16x1xf32> -> vector<2x16x1xf32>
    %59 = vector.broadcast %58 : vector<2x16x1xf32> to vector<2x16x8xf32>
    %60 = arith.mulf %57, %59 : vector<2x16x8xf32>
    %61 = arith.truncf %60 : vector<2x16x8xf32> to vector<2x16x8xbf16>
    %62 = vector.extract_strided_slice %9 {offsets = [0, 0, 16], sizes = [2, 16, 8], strides = [1, 1, 1]} : vector<2x16x96xf32> to vector<2x16x8xf32>
    %cst_24 = arith.constant 0.353553385 : f32
    %63 = vector.broadcast %cst_24 : f32 to vector<2x16x8xf32>
    %64 = arith.mulf %62, %63 : vector<2x16x8xf32>
    %65 = arith.truncf %64 : vector<2x16x8xf32> to vector<2x16x8xbf16>
    %66 = vector.extract_strided_slice %9 {offsets = [0, 0, 48], sizes = [2, 16, 8], strides = [1, 1, 1]} : vector<2x16x96xf32> to vector<2x16x8xf32>
    %67 = arith.truncf %66 : vector<2x16x8xf32> to vector<2x16x8xbf16>
    %68 = vector.extract_strided_slice %9 {offsets = [0, 0, 80], sizes = [2, 16, 8], strides = [1, 1, 1]} : vector<2x16x96xf32> to vector<2x16x8xf32>
    %69 = arith.truncf %68 : vector<2x16x8xf32> to vector<2x16x8xbf16>
    "tpu.trace_start"() <{level = 10 : i32, message = "wnd,wmd->wnm"}> : () -> ()
    %cst_25 = arith.constant dense<0.000000e+00> : vector<2x16x16xf32>
    %70 = tpu.matmul %65, %67, %cst_25 {dimension_numbers = #tpu.dot_dimension_numbers<[2], [2], [1], [1], [0, 0, 0, 1, 1, 1], [0], [0]>} : vector<2x16x8xbf16>, vector<2x16x8xbf16>, vector<2x16x16xf32> -> vector<2x16x16xf32>
    "tpu.trace_stop"() : () -> ()
    %c0_26 = arith.constant 0 : index
    %c2 = arith.constant 2 : index
    %c0_27 = arith.constant 0 : index
    %c0_28 = arith.constant 0 : index
    %71 = vector.load %arg3[%c0_26, %c2, %c0_27, %c0_28] : memref<2x4x16x16xbf16, #tpu.memory_space<vmem>>, vector<2x1x16x16xbf16>
    %72 = vector.shape_cast %71 : vector<2x1x16x16xbf16> to vector<2x16x16xbf16>
    %73 = arith.extf %72 : vector<2x16x16xbf16> to vector<2x16x16xf32>
    %74 = arith.addf %70, %73 : vector<2x16x16xf32>
    %cst_29 = arith.constant dense<0xFF800000> : vector<2x16xf32>
    %75 = vector.multi_reduction <maximumf>, %74, %cst_29 [2] : vector<2x16x16xf32> to vector<2x16xf32>
    %76 = vector.shape_cast %75 : vector<2x16xf32> to vector<2x16x1xf32>
    %77 = vector.broadcast %76 : vector<2x16x1xf32> to vector<2x16x16xf32>
    %78 = arith.subf %74, %77 : vector<2x16x16xf32>
    %79 = math.exp %78 : vector<2x16x16xf32>
    %cst_30 = arith.constant dense<0.000000e+00> : vector<2x16xf32>
    %80 = vector.multi_reduction <add>, %79, %cst_30 [2] : vector<2x16x16xf32> to vector<2x16xf32>
    %81 = vector.shape_cast %80 : vector<2x16xf32> to vector<2x16x1xf32>
    %82 = arith.truncf %79 : vector<2x16x16xf32> to vector<2x16x16xbf16>
    "tpu.trace_start"() <{level = 10 : i32, message = "wnm,wmd->wnd"}> : () -> ()
    %cst_31 = arith.constant dense<0.000000e+00> : vector<2x16x8xf32>
    %83 = tpu.matmul %82, %69, %cst_31 {dimension_numbers = #tpu.dot_dimension_numbers<[2], [1], [1], [2], [0, 0, 0, 1, 1, 2], [0], [0]>} : vector<2x16x16xbf16>, vector<2x16x8xbf16>, vector<2x16x8xf32> -> vector<2x16x8xf32>
    "tpu.trace_stop"() : () -> ()
    %84 = tpu.reciprocal %81 {approx = true} : vector<2x16x1xf32> -> vector<2x16x1xf32>
    %85 = vector.broadcast %84 : vector<2x16x1xf32> to vector<2x16x8xf32>
    %86 = arith.mulf %83, %85 : vector<2x16x8xf32>
    %87 = arith.truncf %86 : vector<2x16x8xf32> to vector<2x16x8xbf16>
    %88 = vector.extract_strided_slice %9 {offsets = [0, 0, 24], sizes = [2, 16, 8], strides = [1, 1, 1]} : vector<2x16x96xf32> to vector<2x16x8xf32>
    %cst_32 = arith.constant 0.353553385 : f32
    %89 = vector.broadcast %cst_32 : f32 to vector<2x16x8xf32>
    %90 = arith.mulf %88, %89 : vector<2x16x8xf32>
    %91 = arith.truncf %90 : vector<2x16x8xf32> to vector<2x16x8xbf16>
    %92 = vector.extract_strided_slice %9 {offsets = [0, 0, 56], sizes = [2, 16, 8], strides = [1, 1, 1]} : vector<2x16x96xf32> to vector<2x16x8xf32>
    %93 = arith.truncf %92 : vector<2x16x8xf32> to vector<2x16x8xbf16>
    %94 = vector.extract_strided_slice %9 {offsets = [0, 0, 88], sizes = [2, 16, 8], strides = [1, 1, 1]} : vector<2x16x96xf32> to vector<2x16x8xf32>
    %95 = arith.truncf %94 : vector<2x16x8xf32> to vector<2x16x8xbf16>
    "tpu.trace_start"() <{level = 10 : i32, message = "wnd,wmd->wnm"}> : () -> ()
    %cst_33 = arith.constant dense<0.000000e+00> : vector<2x16x16xf32>
    %96 = tpu.matmul %91, %93, %cst_33 {dimension_numbers = #tpu.dot_dimension_numbers<[2], [2], [1], [1], [0, 0, 0, 1, 1, 1], [0], [0]>} : vector<2x16x8xbf16>, vector<2x16x8xbf16>, vector<2x16x16xf32> -> vector<2x16x16xf32>
    "tpu.trace_stop"() : () -> ()
    %c0_34 = arith.constant 0 : index
    %c3 = arith.constant 3 : index
    %c0_35 = arith.constant 0 : index
    %c0_36 = arith.constant 0 : index
    %97 = vector.load %arg3[%c0_34, %c3, %c0_35, %c0_36] : memref<2x4x16x16xbf16, #tpu.memory_space<vmem>>, vector<2x1x16x16xbf16>
    %98 = vector.shape_cast %97 : vector<2x1x16x16xbf16> to vector<2x16x16xbf16>
    %99 = arith.extf %98 : vector<2x16x16xbf16> to vector<2x16x16xf32>
    %100 = arith.addf %96, %99 : vector<2x16x16xf32>
    %cst_37 = arith.constant dense<0xFF800000> : vector<2x16xf32>
    %101 = vector.multi_reduction <maximumf>, %100, %cst_37 [2] : vector<2x16x16xf32> to vector<2x16xf32>
    %102 = vector.shape_cast %101 : vector<2x16xf32> to vector<2x16x1xf32>
    %103 = vector.broadcast %102 : vector<2x16x1xf32> to vector<2x16x16xf32>
    %104 = arith.subf %100, %103 : vector<2x16x16xf32>
    %105 = math.exp %104 : vector<2x16x16xf32>
    %cst_38 = arith.constant dense<0.000000e+00> : vector<2x16xf32>
    %106 = vector.multi_reduction <add>, %105, %cst_38 [2] : vector<2x16x16xf32> to vector<2x16xf32>
    %107 = vector.shape_cast %106 : vector<2x16xf32> to vector<2x16x1xf32>
    %108 = arith.truncf %105 : vector<2x16x16xf32> to vector<2x16x16xbf16>
    "tpu.trace_start"() <{level = 10 : i32, message = "wnm,wmd->wnd"}> : () -> ()
    %cst_39 = arith.constant dense<0.000000e+00> : vector<2x16x8xf32>
    %109 = tpu.matmul %108, %95, %cst_39 {dimension_numbers = #tpu.dot_dimension_numbers<[2], [1], [1], [2], [0, 0, 0, 1, 1, 2], [0], [0]>} : vector<2x16x16xbf16>, vector<2x16x8xbf16>, vector<2x16x8xf32> -> vector<2x16x8xf32>
    "tpu.trace_stop"() : () -> ()
    %110 = tpu.reciprocal %107 {approx = true} : vector<2x16x1xf32> -> vector<2x16x1xf32>
    %111 = vector.broadcast %110 : vector<2x16x1xf32> to vector<2x16x8xf32>
    %112 = arith.mulf %109, %111 : vector<2x16x8xf32>
    %113 = arith.truncf %112 : vector<2x16x8xf32> to vector<2x16x8xbf16>
    %114 = tpu.concatenate %35, %61, %87, %113 in 2 : vector<2x16x8xbf16>, vector<2x16x8xbf16>, vector<2x16x8xbf16>, vector<2x16x8xbf16> -> vector<2x16x32xbf16>
    %115 = vector.shape_cast %114 : vector<2x16x32xbf16> to vector<32x32xbf16>
    %c0_40 = arith.constant 0 : index
    %c0_41 = arith.constant 0 : index
    %116 = vector.load %arg6[%c0_40, %c0_41] : memref<32x32xbf16, #tpu.memory_space<vmem>>, vector<32x32xbf16>
    %cst_42 = arith.constant dense<0.000000e+00> : vector<32x32xf32>
    %117 = tpu.matmul %115, %116, %cst_42 {dimension_numbers = #tpu.dot_dimension_numbers<[1], [0], [0], [1], [0, 0, 1, 1], [], []>} : vector<32x32xbf16>, vector<32x32xbf16>, vector<32x32xf32> -> vector<32x32xf32>
    %c0_43 = arith.constant 0 : index
    %c0_44 = arith.constant 0 : index
    %118 = vector.load %arg7[%c0_43, %c0_44] : memref<1x32xf32, #tpu.memory_space<vmem>>, vector<1x32xf32>
    %119 = vector.broadcast %118 : vector<1x32xf32> to vector<32x32xf32>
    %120 = arith.addf %117, %119 : vector<32x32xf32>
    %121 = vector.shape_cast %120 : vector<32x32xf32> to vector<2x16x32xf32>
    %c0_45 = arith.constant 0 : index
    %c0_46 = arith.constant 0 : index
    %c0_47 = arith.constant 0 : index
    %c0_48 = arith.constant 0 : index
    %122 = vector.load %arg8[%c0_45, %c0_46, %c0_47, %c0_48] : memref<1x2x16x32xf32, #tpu.memory_space<vmem>>, vector<1x2x16x32xf32>
    %123 = vector.shape_cast %122 : vector<1x2x16x32xf32> to vector<2x16x32xf32>
    %124 = vector.shape_cast %121 : vector<2x16x32xf32> to vector<1x2x16x32xf32>
    tpu.vector_store %arg8[%c0_45, %c0_46, %c0_47, %c0_48], %124 {strides = array<i32>} : memref<1x2x16x32xf32, #tpu.memory_space<vmem>>, vector<1x2x16x32xf32>,
    return
  }
  func.func @transform_0(%arg0: i32, %arg1: i32) -> (i32, i32, i32, i32) {
    %c0_i32 = arith.constant 0 : i32
    %c0_i32_0 = arith.constant 0 : i32
    %c0_i32_1 = arith.constant 0 : i32
    return %arg1, %arg0, %c0_i32, %c0_i32_0 : i32, i32, i32, i32
  }
  func.func @transform_1(%arg0: i32, %arg1: i32) -> (i32, i32, i32, i32) {
    %c0_i32 = arith.constant 0 : i32
    %c0_i32_0 = arith.constant 0 : i32
    %c0_i32_1 = arith.constant 0 : i32
    %c0_i32_2 = arith.constant 0 : i32
    return %arg0, %c0_i32, %c0_i32_0, %c0_i32_1 : i32, i32, i32, i32
  }
  func.func @transform_2(%arg0: i32, %arg1: i32) -> (i32, i32) {
    %c0_i32 = arith.constant 0 : i32
    %c0_i32_0 = arith.constant 0 : i32
    %c0_i32_1 = arith.constant 0 : i32
    return %c0_i32, %c0_i32_0 : i32, i32
  }
  func.func @transform_3(%arg0: i32, %arg1: i32) -> (i32, i32) {
    %c0_i32 = arith.constant 0 : i32
    %c0_i32_0 = arith.constant 0 : i32
    %c0_i32_1 = arith.constant 0 : i32
    return %c0_i32, %c0_i32_0 : i32, i32
  }
  func.func @transform_4(%arg0: i32, %arg1: i32) -> (i32, i32) {
    %c0_i32 = arith.constant 0 : i32
    %c0_i32_0 = arith.constant 0 : i32
    %c0_i32_1 = arith.constant 0 : i32
    return %c0_i32, %c0_i32_0 : i32, i32
  }
  func.func @transform_5(%arg0: i32, %arg1: i32) -> (i32, i32) {
    %c0_i32 = arith.constant 0 : i32
    %c0_i32_0 = arith.constant 0 : i32
    %c0_i32_1 = arith.constant 0 : i32
    return %c0_i32, %c0_i32_0 : i32, i32
  }
  func.func @transform_6(%arg0: i32, %arg1: i32) -> (i32, i32, i32, i32) {
    %c0_i32 = arith.constant 0 : i32
    %c0_i32_0 = arith.constant 0 : i32
    %c0_i32_1 = arith.constant 0 : i32
    return %arg1, %arg0, %c0_i32, %c0_i32_0 : i32, i32, i32, i32
  }
}

</mosaic_0001>

<bundles_post_ra>
// kernel: tpu_custom_call.1
= control target key start
LH: loop header
LB: loop body
LE: loop exit
PB: predicated region body
PF: predicated region fallthrough
CT: control target
= control target key end

     0   :  { %s2443_s0 = inlined_call_operand.hbm [shape: f32[4,4,16,32], index: 0, kind: input, shape index: {}]   ;;  %s2444_s1 = inlined_call_operand.hbm [shape: bf16[4,4,16,16], index: 1, kind: input, shape index: {}]   ;;  %s2445_s2 = inlined_call_operand.hbm [shape: bf16[32,96], index: 2, kind: input, shape index: {}]   ;;  %s2446_s3 = inlined_call_operand.vmem [shape: f32[1,96], index: 3, kind: input, shape index: {}]   ;;  %s2447_s4 = inlined_call_operand.hbm [shape: bf16[32,32], index: 4, kind: input, shape index: {}]   ;;  %s2448_s5 = inlined_call_operand.vmem [shape: f32[1,32], index: 5, kind: input, shape index: {}]   ;;  %s2449_s6 = inlined_call_operand.hbm [shape: f32[4,4,16,32], index: 6, kind: output, shape index: {}]  }
   0x1   :  { %2461 = sst [smem:[#allocation24_spill]] %s2443_s0 }
   0x2   :  { %2462 = sst [smem:[#allocation25_spill]] %s2445_s2 }
   0x3   :  { %2463 = sst [smem:[#allocation26_spill]] %s2447_s4 }
   0x4   :  { %2464 = sst [smem:[#allocation27_spill]] %s2448_s5 }
   0x5   :  { %2465 = sst [smem:[#allocation28_spill]] %s2449_s6 }
   0x6   :  { %11 = vsyncpa [#allocation3], 0 }
   0x7   :  { %13 = vsyncpa [#allocation3 + $0x1], 0 }
   0x8   :  { %14 = vsyncpa [#allocation6], 0 }
   0x9   :  { %16 = vsyncpa [#allocation6 + $0x1], 0 }
   0xa   :  { %17 = vsyncpa [#allocation9], 0 }
   0xb   :  { %18 = vsyncpa [#allocation4], 0 }
   0xc   :  { %20 = vsyncpa [#allocation4 + $0x1], 0  ;;  %s2001_s21 = smov 0   ;;  %s2003_s22 = smov 0  }
   0xd   :  { %s2005_s23 = smov 0   ;;  %s2007_s24 = smov 0  }
   0xe   :  { %s2009_s25 = smov 0   ;;  %s2011_s26 = smov 0  }
   0xf   :  { %s2013_s27 = smov 0   ;;  %s2015_s28 = smov 0  }
  0x10   :  { %s2017_s29 = smov 0   ;;  %s2019_s30 = smov 0  }
  0x11   :  { %s2021_s7 = smov 0  }
  0x12 LB: > { %2466 = sst [smem:[#allocation16_spill]] %s1915_s24  ;;  %s2055_s8 = sadd.s32 4294967295, %s1943_s7   ;;  %s1943_s7 = sphi %s2021_s7, %s26_s7   ;;  %s1939_s30 = sphi %s2019_s30, %s2501_s30   ;;  %s1935_s29 = sphi %s2017_s29, %s2493_s29   ;;  %s1931_s28 = sphi %s2015_s28, %s2500_s28   ;;  %s1927_s27 = sphi %s2013_s27, %s2492_s27   ;;  %s1923_s26 = sphi %s2011_s26, %s2491_s26   ;;  %s1919_s25 = sphi %s2009_s25, %s2499_s25   ;;  %s1915_s24 = sphi %s2007_s24, %s2498_s24   ;;  %s1911_s23 = sphi %s2005_s23, %s2497_s23   ;;  %s1907_s22 = sphi %s2003_s22, %s2496_s22   ;;  %s1903_s21 = sphi %s2001_s21, %s2495_s21  }
  0x13   : > { %2467 = sst [smem:[#allocation17_spill]] %s1923_s26  ;;  %p86_p0 = scmp.ne.s32.totalorder %s1907_s22, %s1903_s21 }
  0x14   : > { %2468 = sst [smem:[#allocation18_spill]] %s1935_s29  ;;  %p61_p1 = scmp.eq.s32.totalorder %s2055_s8, 0 }
  0x15   : > { %p196_p2 = scmp.eq.s32.totalorder %s2055_s8, 7  ;;  %p1355_p3 = scmp.ge.s32.totalorder %s1943_s7, 1 }
  0x16   : > { %p209_p4 = scmp.lt.s32.totalorder %s1943_s7, 9  ;;  %p2064_p5 = por %p86_p0, %p61_p1 }
  0x17   : > { %s2471_s2 = sld [smem:[#allocation25_spill]]  ;;  %s1945_s14 = smov [#allocation7]  }
  0x18   : > { %p2068_p6 = pnand %p1355_p3, %p209_p4  ;;  %s222_s15 = sshll.u32 %s1945_s14, 4  ;;  %s223_s15 = int_to_ptr.vmem [resolvable:$true] %s222_s15 }
  0x19   : > { %s2472_s4 = sld [smem:[#allocation26_spill]]  ;;  %s2450_s19 = smov 64  }
  0x1a   : > { %p1490_p7 = pneg %p2068_p6  ;;  %s2451_s20 = smov 4  }
  0x1b   : > { %s1948_s21 = smov [#allocation8]   ;;  %s1354_s12 = sadd.s32 4294967294, %s1943_s7  }
  0x1c   : > { %p1491_p8 = pnand %p1490_p7, %p61_p1  ;;  %s239_s11 = sshll.u32 %s1948_s21, 4  ;;  %s240_s11 = int_to_ptr.vmem [resolvable:$true] %s239_s11 }
  0x1d   : > { %s220_s13 = sshll.u32 %s2471_s2, 4  ;;  %s35_s14 = sadd.s32 1, %s1935_s29  ;;  %s221_s13 = int_to_ptr.hbm [resolvable:$true] %s220_s13 }
  0x1e   : > { %1493 = dma.hbm_to_vmem [thread:$0]  (!%p1491_p8), %s221_s13, 256, %s223_s15, [#allocation6], %s2450_s19, %s2450_s19, %s2451_s20  }
  0x1f   : > { %s237_s18 = sshll.u32 %s2472_s4, 4  ;;  %s38_s16 = sadd.s32 1, %s1939_s30  ;;  %s238_s18 = int_to_ptr.hbm [resolvable:$true] %s237_s18 }
  0x20   : > { %1496 = dma.hbm_to_vmem [thread:$0]  (!%p1491_p8), %s238_s18, 256, %s240_s11, [#allocation9], %s2450_s19, %s2450_s19, %s2451_s20  }
  0x21   : > { %p36_p9 = scmp.ge.s32.totalorder %s35_s14, 4  ;;  %s47_s17 = sadd.s32 1, %s1923_s26 }
  0x22   : > { %p54_p10 = scmp.ne.s32.totalorder %s1923_s26, %s1919_s25  ;;  %p55_p11 = scmp.eq.s32.totalorder %s1943_s7, 0 }
  0x23   : > { %s2503_s14 = smov (%p36_p9, %s35_s14), 0  ;;  %s2505_s16 = smov (!%p36_p9, %s38_s16), %s1939_s30 }
  0x24   : > { %2473 = sst [smem:[#allocation19_spill]] %s2503_s14  ;;  %s42_s13 = ssub.s32 %s1935_s29, %s2503_s14 }
  0x25   : > { %p2102_p12 = por %p55_p11, %p54_p10  ;;  %p40_p13 = scmp.ge.s32.totalorder %s2505_s16, 2 }
  0x26   : > { %p60_p0 = scmp.ne.s32.totalorder %s1919_s25, %s1915_s24  ;;  %p2110_p3 = por %p196_p2, %p54_p10 }
  0x27   : > { %p202_p4 = scmp.eq.s32.totalorder %s1354_s12, 7  ;;  %s2507_s16 = smov (%p40_p13, %s2505_s16), 0 }
  0x28   : > { %s2475_s18 = scalar_select %p2110_p3, 1, 0 }
  0x29   : > { %2477 = sst [smem:[#allocation21_spill]] %s2507_s16  ;;  %p2118_p7 = por %p61_p1, %p60_p0 }
  0x2a   : > { %2476 = sst [smem:[#allocation20_spill]] %s2475_s18  ;;  %p2122_p8 = por %p202_p4, %p60_p0 }
  0x2b   : > { %s43_s19 = ssub.s32 %s1939_s30, %s2507_s16  ;;  %p1510_p2 = scmp.lt.s32.totalorder %s1943_s7, 8 }
  0x2c   : > { %s2479_s11 = scalar_select %p2122_p8, 1, 0 }
  0x2d   : > { %s44_s20 = sor.u32 %s43_s19, %s42_s13  ;;  %p71_p9 = scmp.eq.s32.totalorder %s43_s19, 0 }
  0x2e   : > { %2480 = sst [smem:[#allocation22_spill]] %s2479_s11  ;;  %p45_p10 = scmp.eq.s32.totalorder %s44_s20, 0 }
  0x2f   : > { %s256_s12 = sand.u32 1, %s1923_s26   ;;  %s1429_s14 = sshll.u32 %s1939_s30, 2 }
  0x30   : > { %s1359_s2 = sshll.u32 %s256_s12, 5  ;;  %s1362_s24 = sshll.u32 %s1935_s29, 3 }
  0x31   : > { %s2131_s4 = scalar_select %p45_p10, %s1923_s26, %s47_s17  }
  0x32   : > { %s260_s6 = scalar_lea.vmem [#allocation2], %s1359_s2  ;;  %s266_s18 = sadd.s32 %s1429_s14, %s1362_s24 }
  0x33   : > { %2481 = sst [smem:[#allocation23_spill]] %s2131_s4  ;;  %s271_s11 = sshll.u32 %s260_s6, 4  ;;  %s272_s11 = int_to_ptr.vmem [resolvable:$true] %s271_s11 }
  0x34   : > { %s1363_s13 = sshll.u32 %s266_s18, 3  ;;  %p1498_p13 = pnand %p1510_p2, %p2102_p12 }
  0x35   : > { %s2482_s0 = sld [smem:[#allocation24_spill]]  ;;  %s257_s29 = scalar_lea.sflag [#allocation3], %s256_s12 }
  0x36   : > { %s1949_s26 = smov 128   ;;  %s1950_s2 = smov 8  }
  0x37   : > { %s281_s6 = sand.u32 1, %s1943_s7   ;;  %s73_s24 = sadd.s32 1, %s1911_s23 }
  0x38   : > { %p80_p0 = scmp.ne.s32.totalorder %s1911_s23, %s1907_s22  ;;  %s283_s15 = sand.u32 1, %s1911_s23  }
  0x39   : > { %s2148_s14 = scalar_select %p71_p9, %s1911_s23, %s73_s24  }
  0x3a   : > { %p82_p4 = por %p80_p0, %p55_p11  ;;  %s1364_s18 = sshll.u32 %s283_s15, 6 }
  0x3b   : > { %s268_s16 = scalar_lea.hbm %s2482_s0, %s1363_s13  ;;  %s1431_s5 = sshll.u32 %s1939_s30, 6 }
  0x3c   : > { %s269_s4 = sshll.u32 %s268_s16, 4  ;;  %s291_s16 = scalar_lea.hbm %s2444_s1, %s1431_s5  ;;  %s270_s4 = int_to_ptr.hbm [resolvable:$true] %s269_s4 }
  0x3d   : > { %1500 = dma.hbm_to_vmem [thread:$0]  (!%p1498_p13), %s270_s4, 512, %s272_s11, %s257_s29, %s1949_s26, %s1949_s26, %s1950_s2  }
  0x3e   : > { %s292_s12 = sshll.u32 %s291_s16, 4  ;;  %s285_s17 = scalar_lea.vmem [#allocation5], %s1364_s18  ;;  %s293_s12 = int_to_ptr.hbm [resolvable:$true] %s292_s12 }
  0x3f   : > { %s294_s0 = sshll.u32 %s285_s17, 4  ;;  %p1501_p12 = pnand %p1510_p2, %p82_p4  ;;  %s295_s0 = int_to_ptr.vmem [resolvable:$true] %s294_s0 }
  0x40   : > { %s282_s4 = scalar_lea.sflag [#allocation6], %s281_s6  ;;  %s2483_s26 = smov 4  }
  0x41   : > { %s2484_s29 = smov 64   ;;  %306 = sbr.rel (%p2068_p6) target bundleno = 1131 (0x46b), region = 44 }
  0x42   : > { %1503 = dma.hbm_to_vmem [thread:$0]  (!%p1501_p12), %s293_s12, 1024, %s295_s0, %s282_s4, %s2484_s29, %s2484_s29, %s2483_s26  }
  0x43   : > { %s2165_s19 = sand.u32 (!%p2068_p6), 1, %s1919_s25  }
  0x44   : > { %s1369_s5 = sshll.u32 (!%p2068_p6), %s2165_s19, 5  ;;  %s309_s11 = scalar_lea.sflag (!%p2068_p6), [#allocation3], %s2165_s19 }
  0x45   : > { %s312_s2 = scalar_lea.vmem (!%p2068_p6), [#allocation2], %s1369_s5 }
  0x46   : > { %1882 = dma.done.wait (%p2118_p7), %s309_s11, 512  }
  0x47   : > { %1884 = vsyncadd (%p2118_p7), %s309_s11, 4294966784  ;;  %s318_s0 = sand.u32 1, %s2055_s8   ;;  %s320_s10 = sand.u32 1, %s1907_s22  }
  0x48   : > { %s1370_s6 = sshll.u32 %s320_s10, 6  ;;  %s319_s24 = scalar_lea.sflag [#allocation6], %s318_s0 }
  0x49   : > { %s2177_s15 = scalar_lea.vmem [#allocation5], %s1370_s6 }
  0x4a   : > { %1886 = dma.done.wait (%p2064_p5), %s319_s24, 1024  }
  0x4b   : > { %1888 = vsyncadd (%p2064_p5), %s319_s24, 4294966272 }
  0x4c   : > { %1890 = dma.done.wait (%p61_p1), [#allocation6], 256  }
  0x4d   : > { %1892 = vsyncadd (%p61_p1), [#allocation6], 4294967040 }
  0x4e   : > { %1894 = dma.done.wait (%p61_p1), [#allocation9], 256  }
  0x4f   : > { %1896 = vsyncadd (%p61_p1), [#allocation9], 4294967040  ;;  %v1433_v0 = vld [vmem:[#allocation7 + $0x8] sm:$0xff]  ;;  %v1432_v1 = vld [vmem:[#allocation7] sm:$0xff]  ;;  %vm397_vm0 = vcmask 261120   ;;  %s1951_s8 = smov 88  }
  0x50   : > { %v371_v2 = vld [vmem:[%s312_s2] sm:$0xff]  ;;  %410 = vmatpush.bf16.msra.mxu0 %v1433_v0  ;;  %v372_v3 = vld [vmem:[%s312_s2 + $0x8] sm:$0xff]  ;;  %v373_v5 = vld [vmem:[%s312_s2 + $0x10] sm:$0xff]  ;;  %s1952_s18 = smov 96   ;;  %s1953_s20 = smov 120   ;;  %vm455_vm1 = vcmask 64512  }
  0x51   : > { %v375_v4 = vpack.c.bf16 %v372_v3, %v371_v2  ;;  %v374_v6 = vld [vmem:[%s312_s2 + $0x18] sm:$0xff]  ;;  %v1623_v9 = vld [vmem:[%s2446_s3] ss:$0 sm:$0xff]  ;;  %s1954_s13 = smov 112   ;;  %s1955_s16 = smov 80   ;;  %vm508_vm2 = vcmask 130048  }
  0x52   : > { %v376_v7 = vpack.c.bf16 %v374_v6, %v373_v5  ;;  %s1956_s12 = smov 72   ;;  %s1957_s17 = smov 104   ;;  %v1438_v5 = vld [vmem:[%s2177_s15] sm:$0xff]   ;;  %vm1150_vm3 = vcmask 195584  }
  0x53   : > { %s1958_s4 = smov 64   ;;  %s1959_s26 = smov 56  }
  0x54   : > { %411 = vmatpush.bf16.msra.mxu0 %v1432_v1  ;;  %s1960_s29 = smov 48   ;;  %v1470_v1 = vld [vmem:[%s2177_s15 + $0x8] sm:$0xff]   ;;  %s1961_s11 = smov 40  }
  0x55   : > { %v1447_v2 = vunpack.c.l.bf16 %v1470_v1  ;;  %s1962_s2 = smov 8   ;;  %s1963_s0 = smov 16  }
  0x56   : > { %s1964_s10 = smov 24   ;;  %s366_s9 = scalar_lea.vmem [#allocation10], %s1369_s5 }
  0x57   : > { %1382 = vmatmul.msk.bf16.vlgmr.msra.gmra.mxu0 %vm397_vm0, %v375_v4  ;;  %s1436_s21 = sshll.u32 %s1931_s28, 2 }
  0x67   : > { %1383 = vmatmul.msk.bf16.gmra.mxu0 %vm397_vm0, %v376_v7  ;;  %v1439_v7 = vunpack.c.l.bf16 %v1438_v5 }
  0xd4   : > { %v413_v8 = vpop.f32.mrf.mxu0 }
  0xd5   : > { %v414_v10 = vadd.f32 %v1623_v9, %v413_v8  ;;  %v1448_v8 = vunpack.c.h.bf16 %v1470_v1 }
  0xd7   : > { %v431_v12 = vpack.c.bf16 %v414_v10, %v414_v10  ;;  %v423_v16 = vmul.f32 0.35355338, %v414_v10 }
  0xd9   : > { %v450_v17 = vunpack.c.l.b16 %v431_v12  ;;  %v427_v22 = vpack.c.bf16 %v423_v16, %v423_v16 }
  0xdb   : > { %v445_v25 = vunpack.c.l.b16 %v427_v22  ;;  %v1472_v22 = vld [vmem:[%s2177_s15 + $0x10] sm:$0xff]  }
  0xdc   : > { %v415_v11 = vpop.f32.mrf.mxu0 }
  0xdd   : > { %v416_v13 = vadd.f32 %v1623_v9, %v415_v11 }
  0xdf   : > { %v424_v14 = vmul.f32 0.35355338, %v416_v13  ;;  %v432_v15 = vpack.c.bf16 %v416_v13, %v416_v13 }
  0xe1   : > { %v451_v18 = vunpack.c.l.b16 %v432_v15  ;;  %v428_v19 = vpack.c.bf16 %v424_v14, %v424_v14  ;;  %v1440_v15 = vunpack.c.h.bf16 %v1438_v5 }
  0xe3   : > { %v2196_v20 = vpack.c.b16 %v451_v18, %v450_v17  ;;  %v446_v23 = vunpack.c.l.b16 %v428_v19  ;;  %v1469_v19 = vld [vmem:[%s2177_s15 + $0x20] sm:$0xff]  }
  0xe4   : > { %v418_v21 = vpop.f32.mrf.mxu0 }
  0xe5   : > { %622 = vrot.lane.b32.xlu1 %v2196_v20, %s1951_s8  ;;  %453 = vrot.lane.b32.xlu0 %v2196_v20, %s1952_s18  ;;  %v419_v24 = vadd.f32 %v1623_v9, %v418_v21  ;;  %v447_v26 = vpack.c.b16 %v446_v23, %v445_v25  ;;  %v1443_v23 = vunpack.c.l.bf16 %v1469_v19 }
  0xe7   : > { %v433_v27 = vpack.c.bf16 %v419_v24, %v419_v24  ;;  %v425_v29 = vmul.f32 0.35355338, %v419_v24  ;;  %v1456_v24 = vunpack.c.h.bf16 %v1472_v22 }
  0xe9   : > { %v483_v31 = vunpack.c.l.b16 %v433_v27  ;;  %v429_v34 = vpack.c.bf16 %v425_v29, %v425_v29 }
  0xeb   : > { %v478_v38 = vunpack.c.l.b16 %v429_v34 }
  0xec   : > { %v420_v28 = vpop.f32.mrf.mxu0 }
  0xed   : > { %v421_v30 = vadd.f32 %v1623_v9, %v420_v28  ;;  %620 = vrot.lane.b32.xlu1 %v447_v26, %s1953_s20 }
  0xef   : > { %v426_v32 = vmul.f32 0.35355338, %v421_v30  ;;  %v434_v33 = vpack.c.bf16 %v421_v30, %v421_v30 }
  0xf1   : > { %v430_v35 = vpack.c.bf16 %v426_v32, %v426_v32  ;;  %v484_v36 = vunpack.c.l.b16 %v434_v33 }
  0xf3   : > { %v2200_v37 = vpack.c.b16 %v484_v36, %v483_v31  ;;  %v479_v39 = vunpack.c.l.b16 %v430_v35  ;;  %v1444_v31 = vunpack.c.h.bf16 %v1469_v19  ;;  %v1474_v36 = vld [vmem:[%s2177_s15 + $0x18] sm:$0xff]  }
  0xf5   : > { %646 = vrot.lane.b32.xlu2 %v2200_v37, %s1951_s8  ;;  %486 = vrot.lane.b32.xlu0 %v2200_v37, %s1952_s18  ;;  %v480_v40 = vpack.c.b16 %v479_v39, %v478_v38  ;;  %v1464_v38 = vunpack.c.h.bf16 %v1474_v36  ;;  %s1425_s8 = sshll.u32 %s1927_s27, 3  ;;  %s1203_s27 = scalar_lea.sflag [#allocation4], %s2165_s19 }
  0xf6   : > { %779 = vrot.lane.b32.xlu1 %v447_v26, %s1954_s13  ;;  %s1215_s18 = sadd.s32 %s1436_s21, %s1425_s8 }
  0xfd   : > { %781 = vrot.lane.b32.xlu2 %v2196_v20, %s1955_s16  ;;  %644 = vrot.lane.b32.xlu0 %v480_v40, %s1953_s20  ;;  %s1426_s20 = sshll.u32 %s1215_s18, 3 }
  0xfe   : > { %803 = vrot.lane.b32.xlu1 %v480_v40, %s1954_s13 }
 0x105   : > { %805 = vrot.lane.b32.xlu2 %v2200_v37, %s1955_s16  ;;  %940 = vrot.lane.b32.xlu0 %v2196_v20, %s1956_s12 }
 0x106   : > { %962 = vrot.lane.b32.xlu1 %v480_v40, %s1957_s17 }
 0x10d   : > { %964 = vrot.lane.b32.xlu0 %v2200_v37, %s1956_s12  ;;  %938 = vrot.lane.b32.xlu2 %v447_v26, %s1957_s17  ;;  %s2487_s17 = sld [smem:[#allocation28_spill]] }
 0x10e   : > { %554 = vrot.lane.b32.xlu1 %v2196_v20, %s1958_s4 }
 0x113   : > { %s1217_s5 = scalar_lea.hbm %s2487_s17, %s1426_s20 }
 0x115   : > { %579 = vrot.lane.b32.xlu2 %v2200_v37, %s1958_s4  ;;  %s1218_s4 = sshll.u32 %s366_s9, 4  ;;  %s1219_s4 = int_to_ptr.vmem [resolvable:$true] %s1218_s4 }
 0x116   : > { %713 = vrot.lane.b32.xlu1 %v2196_v20, %s1959_s26 }
 0x11e   : > { %872 = vrot.lane.b32.xlu1 %v2196_v20, %s1960_s29 }
 0x14f   : > { %v647_v41 = vpop.permute.xlu2 %646 }
 0x150   : > { %v652_v52 = vsel %vm455_vm1, %v647_v41, 0 }
 0x157   : > { %v782_v42 = vpop.permute.xlu2 %781  ;;  %v623_v43 = vpop.permute.xlu1 %622 }
 0x158   : > { %v454_v44 = vpop.permute.xlu0 %453  ;;  %v628_v45 = vsel %vm455_vm1, %v623_v43, 0  ;;  %v787_v46 = vsel %vm455_vm1, %v782_v42, 0 }
 0x159   : > { %v460_v47 = vsel %vm455_vm1, %v454_v44, 0  ;;  %637 = vmatpush.bf16.xpose.msra.mxu1 %v628_v45  ;;  %v1473_v44 = vld [vmem:[%s2177_s15 + $0x30] sm:$0xff]  }
 0x15a   : > { %469 = vmatpush.bf16.xpose.msra.mxu2 %v460_v47  ;;  %v1459_v45 = vunpack.c.l.bf16 %v1473_v44  ;;  %v1460_v1 = vunpack.c.h.bf16 %v1473_v44 }
 0x15f   : > { %v621_v48 = vpop.permute.xlu1 %620  ;;  %v806_v53 = vpop.permute.xlu2 %805 }
 0x160   : > { %1392 = vmatmul.msk.bf16.vlgmr.msra.gmra.mxu1 %vm455_vm1, %v621_v48  ;;  %v811_v56 = vsel %vm455_vm1, %v806_v53, 0 }
 0x161   : > { %796 = vmatpush.bf16.xpose.msrb.mxu1 %v787_v46  ;;  %1384 = vmatmul.msk.bf16.vlgmr.msra.gmra.mxu2 %vm455_vm1, %v447_v26 }
 0x167   : > { %v487_v49 = vpop.permute.xlu0 %486  ;;  %v939_v57 = vpop.permute.xlu2 %938 }
 0x168   : > { %v780_v50 = vpop.permute.xlu1 %779  ;;  %v492_v51 = vsel %vm455_vm1, %v487_v49, 0  ;;  %v1455_v49 = vunpack.c.l.bf16 %v1472_v22 }
 0x169   : > { %501 = vmatpush.bf16.xpose.msrb.mxu2 %v492_v51  ;;  %v1463_v51 = vunpack.c.l.bf16 %v1474_v36 }
 0x16f   : > { %v645_v54 = vpop.permute.xlu0 %644  ;;  %v580_v0 = vpop.permute.xlu2 %579 }
 0x170   : > { %v804_v55 = vpop.permute.xlu1 %803  ;;  %1400 = vmatmul.msk.bf16.vlgmr.msrb.gmra.mxu1 %vm455_vm1, %v780_v50 }
 0x171   : > { %661 = vmatpush.bf16.xpose.msra.mxu2 %v652_v52 }
 0x172   : > { %1385 = vmatmul.msk.bf16.vlgmr.msrb.gmra.mxu2 %vm455_vm1, %v480_v40 }
 0x177   : > { %v941_v58 = vpop.permute.xlu0 %940 }
 0x178   : > { %v946_v59 = vsel %vm455_vm1, %v941_v58, 0  ;;  %v963_v60 = vpop.permute.xlu1 %962 }
 0x179   : > { %820 = vmatpush.bf16.xpose.msrb.mxu2 %v811_v56  ;;  %955 = vmatpush.bf16.xpose.msra.mxu1 %v946_v59 }
 0x17f   : > { %v965_v61 = vpop.permute.xlu0 %964 }
 0x180   : > { %v970_v62 = vsel %vm455_vm1, %v965_v61, 0  ;;  %v555_v63 = vpop.permute.xlu1 %554  ;;  %1408 = vmatmul.msk.bf16.vlgmr.msra.gmra.mxu1 %vm455_vm1, %v939_v57 }
 0x181   : > { %567 = vmatpush.bf16.msra.mxu3 %v555_v63  ;;  %v1475_v63 = vld [vmem:[%s2177_s15 + $0x38] sm:$0xff]  }
 0x182   : > { %1393 = vmatmul.msk.bf16.vlgmr.msra.gmra.mxu2 %vm455_vm1, %v645_v54 }
 0x183   : > { %979 = vmatpush.bf16.xpose.msra.mxu2 %v970_v62 }
 0x185   : > { %592 = vmatpush.bf16.msrb.mxu3 %v580_v0 }
 0x192   : > { %1401 = vmatmul.msk.bf16.vlgmr.msrb.gmra.mxu2 %vm455_vm1, %v804_v55  ;;  %v1471_v55 = vld [vmem:[%s2177_s15 + $0x28] sm:$0xff]   ;;  %s2485_s15 = sld [smem:[#allocation27_spill]] }
 0x193   : > { %v1451_v56 = vunpack.c.l.bf16 %v1471_v55 }
 0x1a2   : > { %1409 = vmatmul.msk.bf16.vlgmr.msra.gmra.mxu2 %vm455_vm1, %v963_v60  ;;  %v1452_v60 = vunpack.c.h.bf16 %v1471_v55 }
 0x1dd   : > { %v639_v3 = vpop.f32.mrf.mxu1 }
 0x1de   : > { %v2231_v4 = vadd.f32 %v1447_v2, %v639_v3 }
 0x1e0   : > { %v668_v6 = vsel %vm508_vm2, %v2231_v4, -inf }
 0x1e1   : > { %669 = vmax.xlane.f32.xlu0 %v668_v6 }
 0x1e4   : > { %v471_v9 = vpop.f32.mrf.mxu2 }
 0x1e5   : > { %v2236_v10 = vadd.f32 %v1439_v7, %v471_v9  ;;  %v641_v11 = vpop.f32.mrf.mxu1 }
 0x1e6   : > { %v2238_v12 = vadd.f32 %v1448_v8, %v641_v11  ;;  %v1467_v8 = vunpack.c.l.bf16 %v1475_v63 }
 0x1e7   : > { %v509_v13 = vsel %vm508_vm2, %v2236_v10, -inf }
 0x1e8   : > { %510 = vmax.xlane.f32.xlu2 %v509_v13  ;;  %v671_v14 = vsel %vm508_vm2, %v2238_v12, -inf }
 0x1e9   : > { %672 = vmax.xlane.f32.xlu0 %v671_v14  ;;  %v714_v14 = vpop.permute.xlu1 %713 }
 0x1ec   : > { %v473_v16 = vpop.f32.mrf.mxu2 }
 0x1ed   : > { %v2244_v17 = vadd.f32 %v1440_v15, %v473_v16  ;;  %v798_v18 = vpop.f32.mrf.mxu1 }
 0x1ee   : > { %v2276_v50 = vadd.f32 %v1455_v49, %v798_v18 }
 0x1ef   : > { %v512_v21 = vsel %vm508_vm2, %v2244_v17, -inf }
 0x1f0   : > { %v827_v52 = vsel %vm508_vm2, %v2276_v50, -inf }
 0x1f1   : > { %513 = vmax.xlane.f32.xlu0 %v512_v21 }
 0x1f5   : > { %v503_v25 = vpop.f32.mrf.mxu2  ;;  %v800_v27 = vpop.f32.mrf.mxu1 }
 0x1f6   : > { %v2250_v26 = vadd.f32 %v1443_v23, %v503_v25  ;;  %v2252_v28 = vadd.f32 %v1456_v24, %v800_v27  ;;  %v873_v23 = vpop.permute.xlu1 %872 }
 0x1f8   : > { %v515_v29 = vsel %vm508_vm2, %v2250_v26, -inf  ;;  %v830_v30 = vsel %vm508_vm2, %v2252_v28, -inf }
 0x1f9   : > { %516 = vmax.xlane.f32.xlu1 %v515_v29  ;;  %831 = vmax.xlane.f32.xlu2 %v830_v30 }
 0x1fd   : > { %v505_v32 = vpop.f32.mrf.mxu2  ;;  %v957_v34 = vpop.f32.mrf.mxu1 }
 0x1fe   : > { %v2258_v33 = vadd.f32 %v1444_v31, %v505_v32  ;;  %v2282_v54 = vadd.f32 %v1463_v51, %v957_v34 }
 0x200   : > { %v518_v35 = vsel %vm508_vm2, %v2258_v33, -inf  ;;  %v986_v57 = vsel %vm508_vm2, %v2282_v54, -inf }
 0x201   : > { %519 = vmax.xlane.f32.xlu2 %v518_v35 }
 0x205   : > { %v663_v39 = vpop.f32.mrf.mxu2  ;;  %v959_v40 = vpop.f32.mrf.mxu1  ;;  %738 = vrot.lane.b32.xlu0 %v2200_v37, %s1959_s26  ;;  %s1220_s26 = sshll.u32 %s1217_s5, 4  ;;  %s1221_s26 = int_to_ptr.hbm [resolvable:$true] %s1220_s26 }
 0x206   : > { %v2265_v41 = vadd.f32 %v1464_v38, %v959_v40  ;;  %v2287_v58 = vadd.f32 %v1451_v56, %v663_v39  ;;  %s1823_s28 = sshra.s32 %s1221_s26, 4  ;;  %s1824_s28 = int_to_ptr.hbm [resolvable:$true] %s1823_s28 }
 0x207   : > { %p1830_p11 = scmp.lt.s32.totalorder %s1824_s28, %s2487_s17 }
 0x208   : > { %v989_v42 = vsel %vm508_vm2, %v2265_v41, -inf  ;;  %v674_v61 = vsel %vm508_vm2, %v2287_v58, -inf }
 0x209   : > { %990 = vmax.xlane.f32.xlu1 %v989_v42 }
 0x20d   : > { %v665_v43 = vpop.f32.mrf.mxu2 }
 0x20e   : > { %v2291_v62 = vadd.f32 %v1452_v60, %v665_v43 }
 0x210   : > { %v677_v2 = vsel %vm508_vm2, %v2291_v62, -inf }
 0x215   : > { %v822_v46 = vpop.f32.mrf.mxu2 }
 0x216   : > { %v2270_v47 = vadd.f32 %v1459_v45, %v822_v46 }
 0x218   : > { %v833_v48 = vsel %vm508_vm2, %v2270_v47, -inf }
 0x219   : > { %834 = vmax.xlane.f32.xlu2 %v833_v48 }
 0x21d   : > { %v824_v53 = vpop.f32.mrf.mxu2 }
 0x21e   : > { %v2298_v5 = vadd.f32 %v1460_v1, %v824_v53 }
 0x220   : > { %v836_v7 = vsel %vm508_vm2, %v2298_v5, -inf }
 0x222   : > { %897 = vrot.lane.b32.xlu1 %v2200_v37, %s1960_s29  ;;  %s1825_s29 = scalar_lea.hbm %s1824_s28, 32 }
 0x223   : > { %p1826_p1 = scmp.ne.s32.totalorder %s1824_s28, %s1825_s29 }
 0x225   : > { %v981_v59 = vpop.f32.mrf.mxu2  ;;  %p1827_p5 = pnand %p1826_p1, %p2110_p3 }
 0x226   : > { %v2304_v9 = vadd.f32 %v1467_v8, %v981_v59 }
 0x227   : > { %p1828_p6 = pneg %p1827_p5 }
 0x228   : > { %v992_v13 = vsel %vm508_vm2, %v2304_v9, -inf }
 0x22d   : > { %v983_v0 = vpop.f32.mrf.mxu2 }
 0x22f   : > { %828 = vmax.xlane.f32.xlu0 %v827_v52 }
 0x231   : > { %1031 = vrot.lane.b32.xlu2 %v2196_v20, %s1961_s11  ;;  %v1468_v20 = vunpack.c.h.bf16 %v1475_v63 }
 0x233   : > { %v2296_v3 = vadd.f32 %v1468_v20, %v983_v0 }
 0x235   : > { %v995_v6 = vsel %vm508_vm2, %v2296_v3, -inf }
 0x237   : > { %987 = vmax.xlane.f32.xlu0 %v986_v57 }
 0x23f   : > { %675 = vmax.xlane.f32.xlu0 %v674_v61 }
 0x247   : > { %678 = vmax.xlane.f32.xlu0 %v677_v2 }
 0x24c   : > { %996 = vmax.xlane.f32.xlu1 %v995_v6 }
 0x24f   : > { %837 = vmax.xlane.f32.xlu0 %v836_v7 }
 0x254   : > { %v670_v11 = vpop.xlane.xlu0 %669 }
 0x255   : > { %v680_v51 = vsub.f32 %v2231_v4, %v670_v11 }
 0x25a   : > { %993 = vmax.xlane.f32.xlu2 %v992_v13 }
 0x25b   : > { %v511_v15 = vpop.xlane.xlu2 %510 }
 0x25c   : > { %v673_v16 = vpop.xlane.xlu0 %672  ;;  %v521_v18 = vsub.f32 %v2236_v10, %v511_v15 }
 0x25d   : > { %v681_v19 = vsub.f32 %v2238_v12, %v673_v16 }
 0x25e   : > { %v525_v22 = vmul.f32 1.442695, %v521_v18 }
 0x25f   : > { %v686_v21 = vmul.f32 1.442695, %v681_v19 }
 0x261   : > { %1625 = vpow2.f32 %v686_v21 }
 0x262   : > { %1627 = vpow2.f32 %v525_v22 }
 0x263   : > { %1056 = vrot.lane.b32.xlu0 %v2200_v37, %s1961_s11 }
 0x264   : > { %v514_v24 = vpop.xlane.xlu0 %513 }
 0x265   : > { %v522_v25 = vsub.f32 %v2244_v17, %v514_v24 }
 0x267   : > { %v1626_v27 = vpop.eup %1625  ;;  %v527_v29 = vmul.f32 1.442695, %v522_v25 }
 0x268   : > { %v695_v30 = vsel %vm508_vm2, %v1626_v27, 0.0  ;;  %v1628_v10 = vpop.eup %1627  ;;  %v705_v1 = vpack.c.bf16 %v1626_v27, %v1626_v27 }
 0x269   : > { %1629 = vpow2.f32 %v527_v29  ;;  %696 = vadd.xlane.f32.xlu2 %v695_v30  ;;  %v545_v35 = vpack.c.bf16 %v1628_v10, %v1628_v10 }
 0x26a   : > { %v711_v7 = vunpack.c.l.b16 %v705_v1 }
 0x26b   : > { %v551_v40 = vunpack.c.l.b16 %v545_v35 }
 0x26c   : > { %v517_v31 = vpop.xlane.xlu1 %516  ;;  %v832_v12 = vpop.xlane.xlu2 %831 }
 0x26d   : > { %v523_v32 = vsub.f32 %v2250_v26, %v517_v31  ;;  %v840_v34 = vsub.f32 %v2252_v28, %v832_v12 }
 0x26f   : > { %v1630_v36 = vpop.eup %1629  ;;  %v845_v37 = vmul.f32 1.442695, %v840_v34  ;;  %v529_v17 = vmul.f32 1.442695, %v523_v32 }
 0x270   : > { %v536_v38 = vsel %vm508_vm2, %v1630_v36, 0.0  ;;  %v546_v39 = vpack.c.bf16 %v1630_v36, %v1630_v36 }
 0x271   : > { %1631 = vpow2.f32 %v845_v37  ;;  %537 = vadd.xlane.f32.xlu1 %v536_v38 }
 0x272   : > { %v552_v42 = vunpack.c.l.b16 %v546_v39  ;;  %1633 = vpow2.f32 %v529_v17 }
 0x274   : > { %v520_v43 = vpop.xlane.xlu2 %519  ;;  %v553_v44 = vpack.c.b16 %v552_v42, %v551_v40 }
 0x275   : > { %v524_v45 = vsub.f32 %v2258_v33, %v520_v43  ;;  %v684_v33 = vmul.f32 1.442695, %v680_v51 }
 0x276   : > { %1386 = vmatmul.msk.bf16.vlgmr.msra.gmra.mxu3 %vm508_vm2, %v553_v44 }
 0x277   : > { %v1632_v26 = vpop.eup %1631  ;;  %v531_v28 = vmul.f32 1.442695, %v524_v45  ;;  %726 = vmatpush.bf16.msra.mxu3 %v714_v14  ;;  %v739_v46 = vpop.permute.xlu0 %738  ;;  %v533_v14 = vsel %vm508_vm2, %v1628_v10, 0.0 }
 0x278   : > { %751 = vmatpush.bf16.msrb.mxu0 %v739_v46  ;;  %v854_v48 = vsel %vm508_vm2, %v1632_v26, 0.0  ;;  %v1634_v49 = vpop.eup %1633  ;;  %v864_v24 = vpack.c.bf16 %v1632_v26, %v1632_v26 }
 0x279   : > { %1635 = vpow2.f32 %v531_v28  ;;  %855 = vadd.xlane.f32.xlu1 %v854_v48  ;;  %v547_v55 = vpack.c.bf16 %v1634_v49, %v1634_v49 }
 0x27a   : > { %v870_v10 = vunpack.c.l.b16 %v864_v24 }
 0x27b   : > { %v576_v60 = vunpack.c.l.b16 %v547_v55 }
 0x27c   : > { %v991_v52 = vpop.xlane.xlu1 %990 }
 0x27d   : > { %v999_v53 = vsub.f32 %v2265_v41, %v991_v52 }
 0x27f   : > { %v1636_v56 = vpop.eup %1635  ;;  %v1004_v57 = vmul.f32 1.442695, %v999_v53 }
 0x280   : > { %v548_v59 = vpack.c.bf16 %v1636_v56, %v1636_v56  ;;  %v542_v16 = vsel %vm508_vm2, %v1636_v56, 0.0 }
 0x281   : > { %1637 = vpow2.f32 %v1004_v57 }
 0x282   : > { %v577_v61 = vunpack.c.l.b16 %v548_v59  ;;  %1639 = vpow2.f32 %v684_v33 }
 0x284   : > { %v578_v63 = vpack.c.b16 %v577_v61, %v576_v60 }
 0x286   : > { %1387 = vmatmul.msk.bf16.vlgmr.msrb.gmra.mxu3 %vm508_vm2, %v578_v63 }
 0x287   : > { %v1638_v20 = vpop.eup %1637  ;;  %885 = vmatpush.bf16.msrb.mxu3 %v873_v23 }
 0x288   : > { %v1013_v0 = vsel %vm508_vm2, %v1638_v20, 0.0  ;;  %v1640_v4 = vpop.eup %1639  ;;  %v1023_v39 = vpack.c.bf16 %v1638_v20, %v1638_v20 }
 0x289   : > { %1014 = vadd.xlane.f32.xlu1 %v1013_v0  ;;  %v692_v2 = vsel %vm508_vm2, %v1640_v4, 0.0  ;;  %v704_v6 = vpack.c.bf16 %v1640_v4, %v1640_v4 }
 0x28b   : > { %v710_v8 = vunpack.c.l.b16 %v704_v6 }
 0x28c   : > { %v835_v41 = vpop.xlane.xlu2 %834 }
 0x28d   : > { %693 = vadd.xlane.f32.xlu0 %v692_v2  ;;  %v712_v11 = vpack.c.b16 %v711_v7, %v710_v8  ;;  %v841_v17 = vsub.f32 %v2270_v47, %v835_v41 }
 0x28f   : > { %v847_v45 = vmul.f32 1.442695, %v841_v17 }
 0x294   : > { %v898_v13 = vpop.permute.xlu1 %897  ;;  %v1032_v15 = vpop.permute.xlu2 %1031 }
 0x295   : > { %910 = vmatpush.bf16.msra.mxu0 %v898_v13  ;;  %534 = vadd.xlane.f32.xlu0 %v533_v14 }
 0x296   : > { %1394 = vmatmul.msk.bf16.vlgmr.msra.gmra.mxu3 %vm508_vm2, %v712_v11 }
 0x297   : > { %1044 = vmatpush.bf16.msra.mxu3 %v1032_v15 }
 0x29d   : > { %543 = vadd.xlane.f32.xlu0 %v542_v16 }
 0x2a2   : > { %v829_v18 = vpop.xlane.xlu0 %828 }
 0x2a3   : > { %v839_v19 = vsub.f32 %v2276_v50, %v829_v18  ;;  %v539_v50 = vsel %vm508_vm2, %v1634_v49, 0.0 }
 0x2a5   : > { %v843_v21 = vmul.f32 1.442695, %v839_v19 }
 0x2a7   : > { %1641 = vpow2.f32 %v843_v21 }
 0x2aa   : > { %v988_v22 = vpop.xlane.xlu0 %987 }
 0x2ab   : > { %v998_v23 = vsub.f32 %v2282_v54, %v988_v22 }
 0x2ad   : > { %v1642_v25 = vpop.eup %1641  ;;  %v1002_v27 = vmul.f32 1.442695, %v998_v23 }
 0x2ae   : > { %v863_v29 = vpack.c.bf16 %v1642_v25, %v1642_v25  ;;  %v851_v30 = vsel %vm508_vm2, %v1642_v25, 0.0 }
 0x2af   : > { %852 = vadd.xlane.f32.xlu2 %v851_v30  ;;  %1643 = vpow2.f32 %v1002_v27 }
 0x2b0   : > { %v869_v31 = vunpack.c.l.b16 %v863_v29 }
 0x2b2   : > { %v871_v12 = vpack.c.b16 %v870_v10, %v869_v31  ;;  %v676_v32 = vpop.xlane.xlu0 %675 }
 0x2b3   : > { %v682_v34 = vsub.f32 %v2287_v58, %v676_v32  ;;  %v1029_v58 = vunpack.c.l.b16 %v1023_v39 }
 0x2b4   : > { %1402 = vmatmul.msk.bf16.vlgmr.msrb.gmra.mxu3 %vm508_vm2, %v871_v12 }
 0x2b5   : > { %v1644_v35 = vpop.eup %1643  ;;  %v688_v54 = vmul.f32 1.442695, %v682_v34 }
 0x2b6   : > { %v1022_v36 = vpack.c.bf16 %v1644_v35, %v1644_v35  ;;  %v1010_v43 = vsel %vm508_vm2, %v1644_v35, 0.0 }
 0x2b7   : > { %540 = vadd.xlane.f32.xlu2 %v539_v50  ;;  %1645 = vpow2.f32 %v688_v54 }
 0x2b8   : > { %v1028_v42 = vunpack.c.l.b16 %v1022_v36 }
 0x2ba   : > { %v679_v37 = vpop.xlane.xlu0 %678  ;;  %v1030_v26 = vpack.c.b16 %v1029_v58, %v1028_v42 }
 0x2bb   : > { %v683_v38 = vsub.f32 %v2291_v62, %v679_v37 }
 0x2bd   : > { %v690_v40 = vmul.f32 1.442695, %v683_v38  ;;  %v1646_v44 = vpop.eup %1645 }
 0x2be   : > { %v706_v49 = vpack.c.bf16 %v1646_v44, %v1646_v44  ;;  %v698_v53 = vsel %vm508_vm2, %v1646_v44, 0.0 }
 0x2bf   : > { %1647 = vpow2.f32 %v690_v40  ;;  %1011 = vadd.xlane.f32.xlu2 %v1010_v43  ;;  %v997_v28 = vpop.xlane.xlu1 %996 }
 0x2c0   : > { %1649 = vpow2.f32 %v847_v45  ;;  %v1001_v47 = vsub.f32 %v2296_v3, %v997_v28  ;;  %v735_v56 = vunpack.c.l.b16 %v706_v49 }
 0x2c2   : > { %v838_v46 = vpop.xlane.xlu0 %837  ;;  %v1008_v57 = vmul.f32 1.442695, %v1001_v47 }
 0x2c3   : > { %v842_v48 = vsub.f32 %v2298_v5, %v838_v46 }
 0x2c4   : > { %1410 = vmatmul.msk.bf16.vlgmr.msra.gmra.mxu3 %vm508_vm2, %v1030_v26 }
 0x2c5   : > { %v1648_v62 = vpop.eup %1647  ;;  %v849_v51 = vmul.f32 1.442695, %v842_v48 }
 0x2c6   : > { %v707_v52 = vpack.c.bf16 %v1648_v62, %v1648_v62  ;;  %v701_v55 = vsel %vm508_vm2, %v1648_v62, 0.0  ;;  %v1650_v59 = vpop.eup %1649 }
 0x2c7   : > { %1651 = vpow2.f32 %v849_v51  ;;  %699 = vadd.xlane.f32.xlu2 %v698_v53  ;;  %702 = vadd.xlane.f32.xlu1 %v701_v55  ;;  %v857_v20 = vsel %vm508_vm2, %v1650_v59, 0.0  ;;  %v865_v41 = vpack.c.bf16 %v1650_v59, %v1650_v59 }
 0x2c8   : > { %v736_v33 = vunpack.c.l.b16 %v707_v52  ;;  %1653 = vpow2.f32 %v1008_v57 }
 0x2c9   : > { %v894_v11 = vunpack.c.l.b16 %v865_v41 }
 0x2ca   : > { %v737_v5 = vpack.c.b16 %v736_v33, %v735_v56 }
 0x2cc   : > { %1395 = vmatmul.msk.bf16.vlgmr.msrb.gmra.mxu0 %vm508_vm2, %v737_v5 }
 0x2cd   : > { %v994_v60 = vpop.xlane.xlu2 %993  ;;  %v1652_v61 = vpop.eup %1651 }
 0x2ce   : > { %v1000_v3 = vsub.f32 %v2304_v9, %v994_v60  ;;  %v860_v63 = vsel %vm508_vm2, %v1652_v61, 0.0  ;;  %v866_v4 = vpack.c.bf16 %v1652_v61, %v1652_v61  ;;  %v1654_v1 = vpop.eup %1653 }
 0x2cf   : > { %861 = vadd.xlane.f32.xlu0 %v860_v63  ;;  %858 = vadd.xlane.f32.xlu2 %v857_v20  ;;  %v1019_v7 = vsel %vm508_vm2, %v1654_v1, 0.0  ;;  %v1025_v15 = vpack.c.bf16 %v1654_v1, %v1654_v1 }
 0x2d0   : > { %v1006_v0 = vmul.f32 1.442695, %v1000_v3  ;;  %v895_v6 = vunpack.c.l.b16 %v866_v4 }
 0x2d1   : > { %v1054_v18 = vunpack.c.l.b16 %v1025_v15 }
 0x2d2   : > { %1655 = vpow2.f32 %v1006_v0  ;;  %v896_v13 = vpack.c.b16 %v895_v6, %v894_v11 }
 0x2d5   : > { %v1057_v2 = vpop.permute.xlu0 %1056 }
 0x2d6   : > { %1069 = vmatpush.bf16.msrb.mxu0 %v1057_v2 }
 0x2d7   : > { %1020 = vadd.xlane.f32.xlu2 %v1019_v7 }
 0x2d8   : > { %v1656_v8 = vpop.eup %1655 }
 0x2d9   : > { %v1016_v9 = vsel %vm508_vm2, %v1656_v8, 0.0  ;;  %v1024_v14 = vpack.c.bf16 %v1656_v8, %v1656_v8 }
 0x2da   : > { %1017 = vadd.xlane.f32.xlu1 %v1016_v9 }
 0x2db   : > { %v1053_v16 = vunpack.c.l.b16 %v1024_v14 }
 0x2dc   : > { %1403 = vmatmul.msk.bf16.vlgmr.msra.gmra.mxu0 %vm508_vm2, %v896_v13  ;;  %v697_v38 = vpop.xlane.xlu2 %696 }
 0x2dd   : > { %v1055_v19 = vpack.c.b16 %v1054_v18, %v1053_v16 }
 0x2e4   : > { %v538_v21 = vpop.xlane.xlu1 %537 }
 0x2e5   : > { %1657 = vrcp.f32 %v538_v21 }
 0x2eb   : > { %v1658_v24 = vpop.eup %1657 }
 0x2ec   : > { %1411 = vmatmul.msk.bf16.vlgmr.msrb.gmra.mxu0 %vm508_vm2, %v1055_v19  ;;  %v856_v55 = vpop.xlane.xlu1 %855 }
 0x2f9   : > { %v569_v22 = vpop.f32.mrf.mxu3 }
 0x2fc   : > { %v1015_v20 = vpop.xlane.xlu1 %1014 }
 0x300   : > { %v694_v23 = vpop.xlane.xlu0 %693 }
 0x301   : > { %v571_v25 = vpop.f32.mrf.mxu3 }
 0x302   : > { %v604_v27 = vmul.f32 %v1658_v24, %v571_v25 }
 0x304   : > { %v608_v31 = vpack.c.bf16 %v604_v27, %v604_v27 }
 0x306   : > { %v2350_v35 = vunpack.c.l.b16 %v608_v31 }
 0x308   : > { %v535_v29 = vpop.xlane.xlu0 %534 }
 0x309   : > { %1659 = vrcp.f32 %v535_v29  ;;  %v594_v30 = vpop.f32.mrf.mxu3 }
 0x30f   : > { %v1660_v10 = vpop.eup %1659 }
 0x310   : > { %v603_v12 = vmul.f32 %v1660_v10, %v569_v22  ;;  %v544_v32 = vpop.xlane.xlu0 %543 }
 0x311   : > { %1661 = vrcp.f32 %v544_v32  ;;  %v596_v34 = vpop.f32.mrf.mxu3 }
 0x312   : > { %v607_v50 = vpack.c.bf16 %v603_v12, %v603_v12  ;;  %1663 = vrcp.f32 %v694_v23 }
 0x313   : > { %1665 = vrcp.f32 %v697_v38 }
 0x314   : > { %v2352_v54 = vunpack.c.l.b16 %v607_v50 }
 0x316   : > { %v1096_v36 = vpack.c.b16 %v2350_v35, %v2352_v54 }
 0x317   : > { %v1662_v37 = vpop.eup %1661 }
 0x318   : > { %v606_v39 = vmul.f32 %v1662_v37, %v596_v34  ;;  %v1664_v40 = vpop.eup %1663 }
 0x319   : > { %v728_v17 = vpop.f32.mrf.mxu3  ;;  %v1666_v43 = vpop.eup %1665 }
 0x31a   : > { %v762_v42 = vmul.f32 %v1664_v40, %v728_v17  ;;  %v610_v51 = vpack.c.bf16 %v606_v39, %v606_v39 }
 0x31c   : > { %v766_v44 = vpack.c.bf16 %v762_v42, %v762_v42  ;;  %v2357_v56 = vunpack.c.l.b16 %v610_v51 }
 0x31e   : > { %v1102_v46 = vunpack.c.l.b16 %v766_v44 }
 0x321   : > { %v730_v58 = vpop.f32.mrf.mxu3 }
 0x322   : > { %v763_v45 = vmul.f32 %v1666_v43, %v730_v58  ;;  %v853_v26 = vpop.xlane.xlu2 %852 }
 0x324   : > { %v767_v28 = vpack.c.bf16 %v763_v45, %v763_v45 }
 0x326   : > { %v1103_v48 = vunpack.c.l.b16 %v767_v28 }
 0x328   : > { %v1106_v49 = vpack.c.b16 %v1103_v48, %v1102_v46 }
 0x32a   : > { %1108 = vrot.lane.b32.xlu1 %v1106_v49, %s1962_s2  ;;  %v541_v62 = vpop.xlane.xlu2 %540 }
 0x32b   : > { %1667 = vrcp.f32 %v541_v62 }
 0x32c   : > { %1669 = vrcp.f32 %v853_v26 }
 0x32d   : > { %1671 = vrcp.f32 %v856_v55 }
 0x331   : > { %v1668_v47 = vpop.eup %1667 }
 0x332   : > { %v605_v52 = vmul.f32 %v1668_v47, %v594_v30  ;;  %v1012_v59 = vpop.xlane.xlu2 %1011  ;;  %v1670_v60 = vpop.eup %1669 }
 0x333   : > { %v1672_v3 = vpop.eup %1671  ;;  %1673 = vrcp.f32 %v1012_v59 }
 0x334   : > { %v609_v53 = vpack.c.bf16 %v605_v52, %v605_v52 }
 0x336   : > { %v2359_v33 = vunpack.c.l.b16 %v609_v53 }
 0x337   : > { %v887_v57 = vpop.f32.mrf.mxu3 }
 0x338   : > { %v1097_v5 = vpack.c.b16 %v2357_v56, %v2359_v33  ;;  %v921_v61 = vmul.f32 %v1670_v60, %v887_v57 }
 0x339   : > { %v1674_v13 = vpop.eup %1673 }
 0x33a   : > { %v925_v0 = vpack.c.bf16 %v921_v61, %v921_v61  ;;  %v700_v2 = vpop.xlane.xlu2 %699  ;;  %v703_v11 = vpop.xlane.xlu1 %702 }
 0x33b   : > { %1675 = vrcp.f32 %v700_v2 }
 0x33c   : > { %v1116_v41 = vunpack.c.l.b16 %v925_v0  ;;  %1677 = vrcp.f32 %v1015_v20  ;;  %v1434_v20 = vld [vmem:[#allocation8] sm:$0xff] }
 0x33d   : > { %1679 = vrcp.f32 %v703_v11 }
 0x33f   : > { %v889_v63 = vpop.f32.mrf.mxu3 }
 0x340   : > { %v922_v4 = vmul.f32 %v1672_v3, %v889_v63  ;;  %v1435_v63 = vld [vmem:[#allocation8 + $0x8] sm:$0xff] }
 0x341   : > { %v1676_v15 = vpop.eup %1675  ;;  %1185 = vmatpush.bf16.msrb.mxu1 %v1435_v63 }
 0x342   : > { %v926_v1 = vpack.c.bf16 %v922_v4, %v922_v4  ;;  %v1678_v18 = vpop.eup %1677  ;;  %v859_v30 = vpop.xlane.xlu2 %858 }
 0x343   : > { %v1680_v23 = vpop.eup %1679  ;;  %1681 = vrcp.f32 %v859_v30  ;;  %v862_v37 = vpop.xlane.xlu0 %861 }
 0x344   : > { %v1117_v6 = vunpack.c.l.b16 %v926_v1  ;;  %1683 = vrcp.f32 %v862_v37 }
 0x345   : > { %1186 = vmatpush.bf16.msrb.mxu1 %v1434_v20 }
 0x346   : > { %v1120_v7 = vpack.c.b16 %v1117_v6, %v1116_v41 }
 0x347   : > { %v1046_v8 = vpop.f32.mrf.mxu3 }
 0x348   : > { %1122 = vrot.lane.b32.xlu2 %v1120_v7, %s1963_s0  ;;  %v1080_v14 = vmul.f32 %v1674_v13, %v1046_v8 }
 0x349   : > { %v753_v9 = vpop.f32.mrf.mxu0  ;;  %v1682_v17 = vpop.eup %1681 }
 0x34a   : > { %v764_v16 = vmul.f32 %v1676_v15, %v753_v9  ;;  %v1084_v21 = vpack.c.bf16 %v1080_v14, %v1080_v14  ;;  %v1684_v42 = vpop.eup %1683  ;;  %v1021_v48 = vpop.xlane.xlu2 %1020 }
 0x34c   : > { %v768_v25 = vpack.c.bf16 %v764_v16, %v764_v16  ;;  %v1130_v10 = vunpack.c.l.b16 %v1084_v21 }
 0x34d   : > { %v1018_v45 = vpop.xlane.xlu1 %1017 }
 0x34e   : > { %v1104_v32 = vunpack.c.l.b16 %v768_v25  ;;  %1685 = vrcp.f32 %v1018_v45 }
 0x34f   : > { %v1048_v19 = vpop.f32.mrf.mxu3  ;;  %1687 = vrcp.f32 %v1021_v48 }
 0x350   : > { %v1081_v22 = vmul.f32 %v1678_v18, %v1048_v19 }
 0x351   : > { %v755_v24 = vpop.f32.mrf.mxu0 }
 0x352   : > { %v1085_v27 = vpack.c.bf16 %v1081_v22, %v1081_v22  ;;  %v765_v29 = vmul.f32 %v1680_v23, %v755_v24 }
 0x354   : > { %v1131_v31 = vunpack.c.l.b16 %v1085_v27  ;;  %v769_v12 = vpack.c.bf16 %v765_v29, %v765_v29  ;;  %v1686_v47 = vpop.eup %1685 }
 0x355   : > { %v1688_v52 = vpop.eup %1687 }
 0x356   : > { %v1134_v34 = vpack.c.b16 %v1131_v31, %v1130_v10  ;;  %v1105_v50 = vunpack.c.l.b16 %v769_v12 }
 0x358   : > { %v1107_v38 = vpack.c.b16 %v1105_v50, %v1104_v32  ;;  %1136 = vrot.lane.b32.xlu0 %v1134_v34, %s1964_s10 }
 0x359   : > { %v912_v39 = vpop.f32.mrf.mxu0 }
 0x35a   : > { %1110 = vrot.lane.b32.xlu1 %v1107_v38, %s1962_s2  ;;  %v923_v40 = vmul.f32 %v1682_v17, %v912_v39 }
 0x35c   : > { %v927_v58 = vpack.c.bf16 %v923_v40, %v923_v40 }
 0x35e   : > { %v1118_v28 = vunpack.c.l.b16 %v927_v58 }
 0x361   : > { %v914_v43 = vpop.f32.mrf.mxu0 }
 0x362   : > { %v924_v44 = vmul.f32 %v1684_v42, %v914_v43 }
 0x364   : > { %v928_v26 = vpack.c.bf16 %v924_v44, %v924_v44 }
 0x366   : > { %v1119_v46 = vunpack.c.l.b16 %v928_v26 }
 0x368   : > { %v1121_v49 = vpack.c.b16 %v1119_v46, %v1118_v28 }
 0x369   : > { %v1071_v62 = vpop.f32.mrf.mxu0 }
 0x36a   : > { %1124 = vrot.lane.b32.xlu0 %v1121_v49, %s1963_s0  ;;  %v1082_v51 = vmul.f32 %v1686_v47, %v1071_v62 }
 0x36c   : > { %v1086_v55 = vpack.c.bf16 %v1082_v51, %v1082_v51 }
 0x36e   : > { %v1132_v60 = vunpack.c.l.b16 %v1086_v55 }
 0x371   : > { %v1073_v53 = vpop.f32.mrf.mxu0 }
 0x372   : > { %v1083_v57 = vmul.f32 %v1688_v52, %v1073_v53 }
 0x374   : > { %v1087_v59 = vpack.c.bf16 %v1083_v57, %v1083_v57 }
 0x376   : > { %v1133_v61 = vunpack.c.l.b16 %v1087_v59 }
 0x378   : > { %v1135_v3 = vpack.c.b16 %v1133_v61, %v1132_v60 }
 0x37a   : > { %1138 = vrot.lane.b32.xlu2 %v1135_v3, %s1964_s10  ;;  %s1829_s10 = scalar_lea.hbm %s2487_s17, 256 }
 0x37b   : > { %p1831_p7 = scmp.lt.s32.totalorder %s1829_s10, %s1825_s29 }
 0x37d   : > { %p1832_p2 = por %p1831_p7, %p1830_p11 }
 0x37f   : > { %p1833_p9 = pnand %p1832_p2, %p1828_p6 }
 0x39c   : > { %v1109_v0 = vpop.permute.xlu1 %1108 }
 0x39d   : > { %v1142_v1 = vsel %vm455_vm1, %v1096_v36, %v1109_v0  ;;  %v1624_v36 = vld [vmem:[%s2485_s15] ss:$0 sm:$0xff] }
 0x3a2   : > { %v1123_v4 = vpop.permute.xlu2 %1122 }
 0x3a3   : > { %v1147_v41 = vsel %vm508_vm2, %v1142_v1, %v1123_v4 }
 0x3ca   : > { %v1137_v2 = vpop.permute.xlu0 %1136 }
 0x3cb   : > { %v1152_v6 = vsel %vm1150_vm3, %v1147_v41, %v1137_v2 }
 0x3cc   : > { %1420 = vmatmul.msk.bf16.vlgmr.msrb.gmra.mxu1 %vm397_vm0, %v1152_v6  ;;  %v1111_v7 = vpop.permute.xlu1 %1110 }
 0x3cd   : > { %v1145_v8 = vsel %vm455_vm1, %v1097_v5, %v1111_v7 }
 0x3d4   : > { %v1139_v9 = vpop.permute.xlu2 %1138 }
 0x3dc   : > { %v1125_v11 = vpop.permute.xlu0 %1124 }
 0x3dd   : > { %v1149_v35 = vsel %vm508_vm2, %v1145_v8, %v1125_v11 }
 0x3de   : > { %v1154_v54 = vsel %vm1150_vm3, %v1149_v35, %v1139_v9 }
 0x3df   : > { %1421 = vmatmul.msk.bf16.gmra.mxu1 %vm397_vm0, %v1154_v54 }
 0x449   : > { %v1188_v13 = vpop.f32.mrf.mxu1 }
 0x44a   : > { %v1189_v14 = vadd.f32 %v1624_v36, %v1188_v13 }
 0x44c   : > { %1198 = vst.msk [vmem:[%s366_s9] sm:$0xff] %vm397_vm0, %v1189_v14 }
 0x451   : > { %v1190_v56 = vpop.f32.mrf.mxu1 }
 0x452   : > { %v1191_v33 = vadd.f32 %v1624_v36, %v1190_v56 }
 0x454   : > { %1199 = vst.msk [vmem:[%s366_s9 + $0x8] sm:$0xff] %vm397_vm0, %v1191_v33 }
 0x45c   : > { %v1193_v5 = vpop.f32.mrf.mxu1 }
 0x45d   : > { %v1194_v15 = vadd.f32 %v1624_v36, %v1193_v5 }
 0x45f   : > { %1200 = vst.msk [vmem:[%s366_s9 + $0x10] sm:$0xff] %vm397_vm0, %v1194_v15 }
 0x464   : > { %v1195_v16 = vpop.f32.mrf.mxu1 }
 0x465   : > { %v1196_v18 = vadd.f32 %v1624_v36, %v1195_v16 }
 0x467   : > { %1201 = vst.msk [vmem:[%s366_s9 + $0x18] sm:$0xff] %vm397_vm0, %v1196_v18 }
 0x468   : > { %1836 = shalt.err (!%p1833_p9)
}
 0x469   : > { %s1965_s19 = smov 128  }
 0x46a   : > { %1488 = dma.vmem_to_hbm [thread:$0]  (%p2110_p3), %s1219_s4, 512, %s1221_s26, %s1203_s27, %s1965_s19, %s1965_s19, %s1962_s2  }
 0x46b PF: > { %s2488_s15 = sld [smem:[#allocation16_spill]]  ;;  %p1513_p10 = scmp.ge.s32.totalorder %s1943_s7, 2 }
 0x46d   : > { %p1505_p13 = pnand %p1513_p10, %p2122_p8 }
 0x46f   : > { %p1506_p0 = pneg %p1505_p13 }
 0x471   : > { %s1235_s21 = sand.u32 1, %s2488_s15  }
 0x472   : > { %s1236_s8 = scalar_lea.sflag [#allocation4], %s1235_s21 }
 0x473   : > { %1898 = dma.done.wait (%p1506_p0), %s1236_s8, 512  }
 0x474   : > { %1900 = vsyncadd (%p1506_p0), %s1236_s8, 4294966784  ;;  %s26_s7 = sadd.s32 1, %s1943_s7   ;;  %s2490_s2 = sld [smem:[#allocation17_spill]] }
 0x475   : > { %p23_p4 = scmp.ge.s32.totalorder %s26_s7, 10   ;;  %s2491_s26 = sld [smem:[#allocation23_spill]] }
 0x476   : > { %s2492_s27 = sld [smem:[#allocation18_spill]]  ;;  %s2495_s21 = smov %s1907_s22 }
 0x477   : > { %s2493_s29 = sld [smem:[#allocation19_spill]]  ;;  %s2496_s22 = smov %s1911_s23 }
 0x478   : > { %s2494_s18 = sld [smem:[#allocation21_spill]]  ;;  %s2497_s23 = smov %s2148_s14 }
 0x479   : > { %s2498_s24 = smov %s1919_s25  ;;  %s2500_s28 = smov %s1939_s30 }
 0x47a   : > { %s2499_s25 = smov %s2490_s2  ;;  %25 = sbr.rel (!%p23_p4) target bundleno = 18 (0x12), region = 113 }
 0x47e   : > { %s2501_s30 = smov %s2494_s18 }
 0x47f   :  { %1242 = vsyncpa [#allocation3], 1 }
 0x480   :  { %1244 = vsyncpa [#allocation3 + $0x1], 1 }
 0x481   :  { %1245 = vsyncpa [#allocation6], 1 }
 0x482   :  { %1247 = vsyncpa [#allocation6 + $0x1], 1 }
 0x483   :  { %1248 = vsyncpa [#allocation9], 1 }
 0x484   :  { %1249 = vsyncpa [#allocation4], 1 }
 0x485   :  { %1251 = vsyncpa [#allocation4 + $0x1], 1 }

</bundles_post_ra>
